<compile_context>
chip_gen: v7x
topology: tpu7x:2x2x1
jax: 0.10.0
libtpu: 0.0.40
codegen_flags: <defaults>
</compile_context>

<pallas_src>
import functools

import jax
import jax.numpy as jnp
from jax.experimental import pallas as pl
from jax.experimental.pallas import tpu as pltpu


_NC = 128  # point-chunk size (reduction axis of the voxel sweep)


def _round_up(x, m):
    return ((x + m - 1) // m) * m


def _pick_voxel_tile(V):
    """Largest lane-dense tile (multiple of 128, <= 512) dividing V, else V."""
    for cand in (512, 384, 256, 128):
        if V >= cand and V % cand == 0:
            return cand
    return V


# ----------------------------------------------------------------------------
# Kernel 1: point quantization + flat voxel-id computation (hoisted here so the
# voxel sweep never redoes this O(N) work per voxel tile).
# ----------------------------------------------------------------------------
def _quantize_flat_kernel(osc_ref, pts_ref, quant_ref, flat_ref, *, T, Z, Y, X):
    p = pts_ref[...]                                              # [nc, 4] f32
    osc = osc_ref[...]                                            # [2, 4] f32
    off = osc[0:1, :]                                             # [1, 4]
    scl = osc[1:2, :]                                             # [1, 4]
    q = (p - off) / scl                                           # point_quantization
    quant_ref[...] = q

    idx = jnp.floor(q).astype(jnp.int32)
    x = idx[:, 0:1]
    y = idx[:, 1:2]
    z = idx[:, 2:3]
    t = idx[:, 3:4]
    valid = ((x >= 0) & (x < X) & (y >= 0) & (y < Y) &
             (z >= 0) & (z < Z) & (t >= 0) & (t < T))             # [nc, 1]
    flat = ((t * Z + z) * Y + y) * X + x                          # x fastest
    # -1 sentinel: voxel ids in the sweep are always >= 0, so invalid / padded
    # points never match any one-hot column.
    flat_ref[...] = jnp.where(valid, flat, -1)


def quantize_and_flatten(points_4d, offset, scale, *, T, Z, Y, X):
    """points_4d: [N, 4] f32 -> (quant [N_pad, 4] f32, flat voxel ids [N_pad, 1] i32)."""
    N = points_4d.shape[0]
    N_pad = _round_up(max(N, _NC), _NC)
    points_4d = points_4d.astype(jnp.float32)
    if N_pad != N:
        # Pad with points far outside the bbox -> quantize to invalid -> flat=-1.
        pad = jnp.full((N_pad - N, 4), -1.0e6, jnp.float32)
        points_4d = jnp.concatenate([points_4d, pad], axis=0)

    # Offset / scaler are passed as a tiny [2, 4] input (Pallas disallows
    # captured array constants inside the kernel body).
    osc = jnp.array([offset, scale], dtype=jnp.float32)           # [2, 4]

    # NOTE: the [N, 4] / [N, 1] (point index on sublanes) layout is kept on
    # purpose: it yields flat voxel ids in column layout, which is the
    # MXU-natural RHS layout for the one-hot contraction in the voxel sweep
    # (no in-kernel transposes anywhere). The lane padding only touches these
    # tiny per-point arrays.
    kernel = functools.partial(_quantize_flat_kernel, T=T, Z=Z, Y=Y, X=X)
    quant, flat = pl.pallas_call(
        kernel,
        out_shape=(jax.ShapeDtypeStruct((N_pad, 4), jnp.float32),
                   jax.ShapeDtypeStruct((N_pad, 1), jnp.int32)),
        grid=(N_pad // _NC,),
        in_specs=[pl.BlockSpec((2, 4), lambda i: (0, 0)),
                  pl.BlockSpec((_NC, 4), lambda i: (i, 0))],
        out_specs=(pl.BlockSpec((_NC, 4), lambda i: (i, 0)),
                   pl.BlockSpec((_NC, 1), lambda i: (i, 0))),
        compiler_params=pltpu.CompilerParams(dimension_semantics=("parallel",)),
    )(osc, points_4d)
    return quant, flat


# ----------------------------------------------------------------------------
# Kernel 2: voxelize (unweighted average via one fused one-hot matmul) + per-voxel
# linear projection, emitted lane-dense as [F, V].
# ----------------------------------------------------------------------------
def _voxelize_project_kernel(counts_ref, flat_ref, wt_ref, b_ref, out_ref, acc_ref,
                             *, Vt, F):
    v = pl.program_id(0)          # voxel tile (parallel)
    n = pl.program_id(1)          # point chunk (reduction, last)

    @pl.when(n == 0)
    def _init():
        acc_ref[...] = jnp.zeros_like(acc_ref)

    # Skip the one-hot / matmul entirely for voxel tiles with no points.
    @pl.when(counts_ref[v] > 0)
    def _accumulate():
        flat = flat_ref[...]                                              # [nc, 1] i32
        nc = flat.shape[0]
        vids = v * Vt + jax.lax.broadcasted_iota(jnp.int32, (1, Vt), 1)   # [1, Vt]
        # one-hot in [points, voxels] layout: point index on sublanes, voxel id
        # on lanes -> natural MXU RHS, lane-dense accumulator and output.
        onehot = (flat == vids).astype(jnp.float32).astype(jnp.bfloat16)  # [nc, Vt]
        # All-ones features (per the reference module), with one extra ones row
        # that folds the per-voxel point counts into the same matmul.
        feats_aug = jnp.ones((F + 1, nc), jnp.bfloat16)                   # [F+1, nc]
        acc_ref[...] += jnp.dot(feats_aug, onehot,
                                preferred_element_type=jnp.float32)       # [F+1, Vt]

    @pl.when(n == pl.num_programs(1) - 1)
    def _finalize():
        sums = acc_ref[0:F, :]                                   # [F, Vt]
        counts = acc_ref[F:F + 1, :]                             # [1, Vt]
        avg = sums / jnp.maximum(counts, 1.0)                    # unweighted average
        occupied = (counts > 0.0).astype(jnp.float32)            # [1, Vt]
        # Per-voxel linear projection (stand-in for MinkUNet14); unoccupied
        # voxels stay zero, matching MinkowskiEngine .dense().
        proj = jnp.dot(wt_ref[...], avg,
                       preferred_element_type=jnp.float32) + b_ref[...]   # [F, Vt]
        out_ref[...] = (proj * occupied).astype(out_ref.dtype)


def voxelize_and_project(flat_ids, w, b, *, V, F):
    """flat_ids: [N_pad, 1] int32 -> dense feature volume [F, V] f32."""
    N_pad = flat_ids.shape[0]
    Vt = _pick_voxel_tile(V)
    assert V % Vt == 0
    num_vtiles = V // Vt
    num_chunks = N_pad // _NC

    # Per-voxel-tile point counts (scalar-prefetched so empty tiles skip work).
    flat_1d = flat_ids[:, 0]
    tile_of_point = jnp.where(flat_1d >= 0, flat_1d // Vt, num_vtiles)
    tile_counts = jnp.zeros((num_vtiles + 1,), jnp.int32).at[tile_of_point].add(1)
    tile_counts = tile_counts[:num_vtiles]

    w_t = jnp.asarray(w, jnp.float32).T              # [F, F], transposed once in glue
    b_col = jnp.asarray(b, jnp.float32).reshape(F, 1)

    kernel = functools.partial(_voxelize_project_kernel, Vt=Vt, F=F)
    dense_fv = pl.pallas_call(
        kernel,
        out_shape=jax.ShapeDtypeStruct((F, V), jnp.float32),
        grid_spec=pltpu.PrefetchScalarGridSpec(
            num_scalar_prefetch=1,
            grid=(num_vtiles, num_chunks),
            in_specs=[
                pl.BlockSpec((_NC, 1), lambda v, n, cnt: (n, 0)),
                pl.BlockSpec((F, F), lambda v, n, cnt: (0, 0)),
                pl.BlockSpec((F, 1), lambda v, n, cnt: (0, 0)),
            ],
            out_specs=pl.BlockSpec((F, Vt), lambda v, n, cnt: (0, v)),
            scratch_shapes=[pltpu.VMEM((F + 1, Vt), jnp.float32)],
        ),
        compiler_params=pltpu.CompilerParams(
            dimension_semantics=("parallel", "arbitrary")),
    )(tile_counts, flat_ids, w_t, b_col)
    return dense_fv  # [F, V]


# ----------------------------------------------------------------------------
# SparseEncoder4D forward (JAX glue + Pallas kernels)
# ----------------------------------------------------------------------------
def sparse_encoder_4d_forward(cfg, feat_volume_shape, batch, w, b):
    B, F, T, Z, Y, X = feat_volume_shape
    meta_info, in_points_4d, out_origin, out_points_4d = batch
    # out_origin / out_points_4d are quantized by the reference point_quantization
    # but never consumed by the encoder -> dead code, dropped here.
    del meta_info, out_origin, out_points_4d

    x0, y0, z0 = cfg["data"]["scene_bbox"][:3]
    vs = float(cfg["data"]["voxel_size"])
    off4 = (float(x0), float(y0), float(z0), 0.0)
    scl4 = (vs, vs, vs, 1.0)

    pts = in_points_4d.reshape(-1, 4)
    N = pts.shape[0]

    # Fused point_quantization + voxel-id computation.
    quant, flat_ids = quantize_and_flatten(pts, off4, scl4, T=T, Z=Z, Y=Y, X=X)
    in_points_quant = quant[:N]

    V = T * Z * Y * X
    dense_fv = voxelize_and_project(flat_ids, w, b, V=V, F=F)     # [F, V]

    # [F, V] -> [B, F, T, Z, Y, X]; V is flattened (t, z, y, x) with x fastest,
    # so this is a pure reshape (no HBM transpose pass).
    feat_volume = dense_fv.reshape(F, T, Z, Y, X)[None]
    assert feat_volume.shape == (B, F, T, Z, Y, X)
    return feat_volume, in_points_quant


# ----------------------------------------------------------------------------
# Pure-JAX reference for validation
# ----------------------------------------------------------------------------
def _reference_forward(points_4d, w, b, off4, scl4, T, Z, Y, X, F):
    quant = (points_4d - jnp.asarray(off4, jnp.float32)) / jnp.asarray(scl4, jnp.float32)
    idx = jnp.floor(quant).astype(jnp.int32)
    x, y, z, t = idx[:, 0], idx[:, 1], idx[:, 2], idx[:, 3]
    valid = (x >= 0) & (x < X) & (y >= 0) & (y < Y) & (z >= 0) & (z < Z) & (t >= 0) & (t < T)
    V = T * Z * Y * X
    flat = jnp.where(valid, ((t * Z + z) * Y + y) * X + x, V)
    feats = jnp.ones((points_4d.shape[0], F), jnp.float32)
    sums = jax.ops.segment_sum(feats * valid[:, None].astype(jnp.float32),
                               flat, num_segments=V + 1)[:V]
    counts = jax.ops.segment_sum(valid.astype(jnp.float32), flat, num_segments=V + 1)[:V]
    avg = sums / jnp.maximum(counts[:, None], 1.0)
    occupied = (counts > 0).astype(jnp.float32)[:, None]
    dense = (avg @ w + b[None, :]) * occupied                      # [V, F]
    vol = dense.reshape(T, Z, Y, X, F).transpose(4, 0, 1, 2, 3)[None]
    return quant, vol


if __name__ == "__main__":
    key = jax.random.PRNGKey(0)

    # Small configuration consistent with the module.
    B, F, T, Z, Y, X = 1, 8, 2, 4, 8, 16
    feat_volume_shape = [B, F, T, Z, Y, X]
    voxel_size = 0.5
    scene_bbox = [-4.0, -2.0, -1.0, 4.0, 2.0, 1.0]
    cfg = {"data": {"scene_bbox": scene_bbox, "voxel_size": voxel_size}}

    N_in, M_orig, M_out = 256, 8, 64
    k1, k2, k3, k4, k5 = jax.random.split(key, 5)
    lo = jnp.array([scene_bbox[0], scene_bbox[1], scene_bbox[2], 0.0], jnp.float32)
    # t in [0, 1): the second half of the time axis stays empty, exercising the
    # empty-voxel-tile skip path and the zero-fill of unoccupied voxels.
    hi = lo + jnp.array([X * voxel_size, Y * voxel_size, Z * voxel_size, 1.0], jnp.float32)

    in_points_4d = jax.random.uniform(k1, (1, N_in, 4), minval=lo, maxval=hi)
    out_points_4d = jax.random.uniform(k2, (1, M_out, 4), minval=lo, maxval=hi)
    out_origin = jax.random.uniform(k3, (1, M_orig, 3), minval=lo[:3], maxval=hi[:3])
    batch = (None, in_points_4d, out_origin, out_points_4d)

    # Deterministic parameters for the per-voxel projection (stand-in for
    # MinkUNet14, in_channels = out_channels = F).
    w = 0.1 * jax.random.normal(k4, (F, F), jnp.float32) + jnp.eye(F, dtype=jnp.float32)
    b = 0.1 * jax.random.normal(k5, (F,), jnp.float32)

    feat_volume, in_points_quant = sparse_encoder_4d_forward(
        cfg, feat_volume_shape, batch, w, b)
    feat_volume = jax.block_until_ready(feat_volume)

    # Validate against the pure-JAX reference.
    off4 = (scene_bbox[0], scene_bbox[1], scene_bbox[2], 0.0)
    scl4 = (voxel_size, voxel_size, voxel_size, 1.0)
    quant_ref, vol_ref = _reference_forward(
        in_points_4d.reshape(-1, 4), w, b, off4, scl4, T, Z, Y, X, F)

    assert in_points_quant.shape == (N_in, 4)
    assert jnp.allclose(in_points_quant, quant_ref, atol=1e-5, rtol=1e-5)
    assert feat_volume.shape == (B, F, T, Z, Y, X)
    assert jnp.allclose(feat_volume, vol_ref, atol=1e-4, rtol=1e-4)

    print("KERNEL_OK")
</pallas_src>

<mosaic_0001>
module attributes {stable_mosaic.version = 11 : i64} {
  func.func @_quantize_flat_kernel(%arg0: i32, %arg1: memref<2x4xf32, #tpu.memory_space<vmem>>, %arg2: memref<128x4xf32, #tpu.memory_space<vmem>>, %arg3: memref<128x4xf32, #tpu.memory_space<vmem>>, %arg4: memref<128x1xi32, #tpu.memory_space<vmem>>) attributes {dimension_semantics = [#tpu.dimension_semantics<parallel>], iteration_bounds = array<i64: 2>, scalar_prefetch = 0 : i64, scratch_operands = 0 : i64, tpu.core_type = #tpu.core_type<tc>, window_params = [{pipeline_mode = #tpu.pipeline_mode<synchronous>, transform_indices = @transform_0, window_bounds = array<i64: 2, 4>}, {transform_indices = @transform_1, window_bounds = array<i64: 128, 4>}, {transform_indices = @transform_2, window_bounds = array<i64: 128, 4>}, {transform_indices = @transform_3, window_bounds = array<i64: 128, 1>}]} {
    %c0 = arith.constant 0 : index
    %c0_0 = arith.constant 0 : index
    %0 = vector.load %arg2[%c0, %c0_0] : memref<128x4xf32, #tpu.memory_space<vmem>>, vector<128x4xf32>
    %c0_1 = arith.constant 0 : index
    %c0_2 = arith.constant 0 : index
    %1 = vector.load %arg1[%c0_1, %c0_2] : memref<2x4xf32, #tpu.memory_space<vmem>>, vector<2x4xf32>
    %2 = vector.extract_strided_slice %1 {offsets = [0, 0], sizes = [1, 4], strides = [1, 1]} : vector<2x4xf32> to vector<1x4xf32>
    %3 = vector.extract_strided_slice %1 {offsets = [1, 0], sizes = [1, 4], strides = [1, 1]} : vector<2x4xf32> to vector<1x4xf32>
    %4 = vector.broadcast %2 : vector<1x4xf32> to vector<128x4xf32>
    %5 = arith.subf %0, %4 : vector<128x4xf32>
    %6 = vector.broadcast %3 : vector<1x4xf32> to vector<128x4xf32>
    %7 = arith.divf %5, %6 : vector<128x4xf32>
    %c0_3 = arith.constant 0 : index
    %c0_4 = arith.constant 0 : index
    %8 = vector.load %arg3[%c0_3, %c0_4] : memref<128x4xf32, #tpu.memory_space<vmem>>, vector<128x4xf32>
    tpu.vector_store %arg3[%c0_3, %c0_4], %7 {strides = array<i32>} : memref<128x4xf32, #tpu.memory_space<vmem>>, vector<128x4xf32>,
    %9 = math.floor %7 : vector<128x4xf32>
    %10 = arith.fptosi %9 : vector<128x4xf32> to vector<128x4xi32>
    %11 = vector.extract_strided_slice %10 {offsets = [0, 0], sizes = [128, 1], strides = [1, 1]} : vector<128x4xi32> to vector<128x1xi32>
    %12 = vector.extract_strided_slice %10 {offsets = [0, 1], sizes = [128, 1], strides = [1, 1]} : vector<128x4xi32> to vector<128x1xi32>
    %13 = vector.extract_strided_slice %10 {offsets = [0, 2], sizes = [128, 1], strides = [1, 1]} : vector<128x4xi32> to vector<128x1xi32>
    %14 = vector.extract_strided_slice %10 {offsets = [0, 3], sizes = [128, 1], strides = [1, 1]} : vector<128x4xi32> to vector<128x1xi32>
    %c0_i32 = arith.constant 0 : i32
    %15 = vector.broadcast %c0_i32 : i32 to vector<128x1xi32>
    %16 = arith.cmpi sge, %11, %15 : vector<128x1xi32>
    %c16_i32 = arith.constant 16 : i32
    %17 = vector.broadcast %c16_i32 : i32 to vector<128x1xi32>
    %18 = arith.cmpi slt, %11, %17 : vector<128x1xi32>
    %19 = arith.andi %16, %18 : vector<128x1xi1>
    %c0_i32_5 = arith.constant 0 : i32
    %20 = vector.broadcast %c0_i32_5 : i32 to vector<128x1xi32>
    %21 = arith.cmpi sge, %12, %20 : vector<128x1xi32>
    %22 = arith.andi %19, %21 : vector<128x1xi1>
    %c8_i32 = arith.constant 8 : i32
    %23 = vector.broadcast %c8_i32 : i32 to vector<128x1xi32>
    %24 = arith.cmpi slt, %12, %23 : vector<128x1xi32>
    %25 = arith.andi %22, %24 : vector<128x1xi1>
    %c0_i32_6 = arith.constant 0 : i32
    %26 = vector.broadcast %c0_i32_6 : i32 to vector<128x1xi32>
    %27 = arith.cmpi sge, %13, %26 : vector<128x1xi32>
    %28 = arith.andi %25, %27 : vector<128x1xi1>
    %c4_i32 = arith.constant 4 : i32
    %29 = vector.broadcast %c4_i32 : i32 to vector<128x1xi32>
    %30 = arith.cmpi slt, %13, %29 : vector<128x1xi32>
    %31 = arith.andi %28, %30 : vector<128x1xi1>
    %c0_i32_7 = arith.constant 0 : i32
    %32 = vector.broadcast %c0_i32_7 : i32 to vector<128x1xi32>
    %33 = arith.cmpi sge, %14, %32 : vector<128x1xi32>
    %34 = arith.andi %31, %33 : vector<128x1xi1>
    %c2_i32 = arith.constant 2 : i32
    %35 = vector.broadcast %c2_i32 : i32 to vector<128x1xi32>
    %36 = arith.cmpi slt, %14, %35 : vector<128x1xi32>
    %37 = arith.andi %34, %36 : vector<128x1xi1>
    %c4_i32_8 = arith.constant 4 : i32
    %38 = vector.broadcast %c4_i32_8 : i32 to vector<128x1xi32>
    %39 = arith.muli %14, %38 : vector<128x1xi32>
    %40 = arith.addi %39, %13 : vector<128x1xi32>
    %c8_i32_9 = arith.constant 8 : i32
    %41 = vector.broadcast %c8_i32_9 : i32 to vector<128x1xi32>
    %42 = arith.muli %40, %41 : vector<128x1xi32>
    %43 = arith.addi %42, %12 : vector<128x1xi32>
    %c16_i32_10 = arith.constant 16 : i32
    %44 = vector.broadcast %c16_i32_10 : i32 to vector<128x1xi32>
    %45 = arith.muli %43, %44 : vector<128x1xi32>
    %46 = arith.addi %45, %11 : vector<128x1xi32>
    %c-1_i32 = arith.constant -1 : i32
    %47 = vector.broadcast %c-1_i32 : i32 to vector<128x1xi32>
    %48 = arith.select %37, %46, %47 : vector<128x1xi1>, vector<128x1xi32>
    %c0_11 = arith.constant 0 : index
    %c0_12 = arith.constant 0 : index
    %49 = vector.load %arg4[%c0_11, %c0_12] : memref<128x1xi32, #tpu.memory_space<vmem>>, vector<128x1xi32>
    tpu.vector_store %arg4[%c0_11, %c0_12], %48 {strides = array<i32>} : memref<128x1xi32, #tpu.memory_space<vmem>>, vector<128x1xi32>,
    return
  }
  func.func @transform_0(%arg0: i32) -> (i32, i32) {
    %c0_i32 = arith.constant 0 : i32
    %c0_i32_0 = arith.constant 0 : i32
    %c0_i32_1 = arith.constant 0 : i32
    return %c0_i32, %c0_i32_0 : i32, i32
  }
  func.func @transform_1(%arg0: i32) -> (i32, i32) {
    %c0_i32 = arith.constant 0 : i32
    %c0_i32_0 = arith.constant 0 : i32
    return %arg0, %c0_i32 : i32, i32
  }
  func.func @transform_2(%arg0: i32) -> (i32, i32) {
    %c0_i32 = arith.constant 0 : i32
    %c0_i32_0 = arith.constant 0 : i32
    return %arg0, %c0_i32 : i32, i32
  }
  func.func @transform_3(%arg0: i32) -> (i32, i32) {
    %c0_i32 = arith.constant 0 : i32
    %c0_i32_0 = arith.constant 0 : i32
    return %arg0, %c0_i32 : i32, i32
  }
}

</mosaic_0001>

<bundles_post_ra>
// kernel: tpu_custom_call.1
= control target key start
LH: loop header
LB: loop body
LE: loop exit
PB: predicated region body
PF: predicated region fallthrough
CT: control target
= control target key end

     0   :  { %s1283_s12 = smov 0   ;;  %s2885_s0 = inlined_call_operand.vmem [shape: f32[2,4], index: 0, kind: input, shape index: {}]   ;;  %s2886_s1 = inlined_call_operand.vmem [shape: f32[256,4], index: 1, kind: input, shape index: {}]   ;;  %s2887_s2 = inlined_call_operand.vmem [shape: f32[256,4], index: 2, kind: output, shape index: {0}]   ;;  %s2888_s3 = inlined_call_operand.vmem [shape: s32[256,1], index: 3, kind: output, shape index: {1}]  }
   0x1 LB: > { %s1186_s13 = sadd.s32 4294967295, %s1254_s12   ;;  %p1190_p0 = scmp.ge.s32.totalorder %s1254_s12, 1  ;;  %s1254_s12 = sphi %s1283_s12, %s14_s12  }
   0x2   : > { %p141_p1 = scmp.lt.s32.totalorder %s1254_s12, 3 }
   0x4   : > { %p142_p2 = pnand %p1190_p0, %p141_p1 }
   0x6   : > { %145 = sbr.rel (%p142_p2) target bundleno = 584 (0x248), region = 28 }
   0xd   : > { %s1191_s14 = sshll.u32 %s1186_s13, 4  ;;  %v205_v0 = vlaneseq  ;;  %v204_v2 = vld [vmem:[%s2885_s0] sm:$0x3]  ;;  %vm246_vm0 = vcmask 31744   ;;  %s1257_s24 = smov 127  }
   0xe   : > { %p171_p3 = scmp.lt.s32.totalorder %s1191_s14, 31  ;;  %s1258_s25 = smov 126  }
   0xf   : > { %v206_v1 = vshrl.u32 %v205_v0, 7  ;;  %s1259_s26 = smov 125   ;;  %s1260_s27 = smov 1  }
  0x10   : > { %s3265_s14 = smov (!%p171_p3, %s1191_s14), 31  ;;  %s1261_s28 = smov 2  }
  0x11   : > { %v227_v3 = vsub.s32 1, %v206_v1  ;;  %s1294_s17 = sshll.u32 %s3265_s14, 3  ;;  %v207_v5 = vsub.s32 0, %v206_v1  ;;  %s1262_s29 = smov 3  }
  0x12   : > { %s1300_s20 = scalar_lea.vmem %s2886_s1, %s1294_s17  ;;  %s1348_s23 = scalar_lea.vmem %s2887_s2, %s1294_s17 }
  0x13   : > { %v228_v4 = vrot.slane %v204_v2, %v227_v3  ;;  %v190_v6 = vld [vmem:[%s1300_s20 + $0x10] sm:$0xff]  ;;  %v1303_v7 = vrot.slane %v204_v2, %v207_v5  ;;  %v188_v8 = vld [vmem:[%s1300_s20] sm:$0xff]  ;;  %v191_v9 = vld [vmem:[%s1300_s20 + $0x18] sm:$0xff]  ;;  %s2816_s5 = scalar_lea.vmem %s2888_s3, %s1294_s17 }
  0x14   : > { %v189_v10 = vld [vmem:[%s1300_s20 + $0x8] sm:$0xff]  ;;  %v192_v12 = vld [vmem:[%s1300_s20 + $0x20] sm:$0xff]  ;;  %v195_v13 = vld [vmem:[%s1300_s20 + $0x38] sm:$0xff] }
  0x15   : > { %1246 = vrcp.f32 %v228_v4  ;;  %v193_v11 = vld [vmem:[%s1300_s20 + $0x28] sm:$0xff]  ;;  %v194_v14 = vld [vmem:[%s1300_s20 + $0x30] sm:$0xff]  ;;  %v1316_v16 = vld [vmem:[%s1300_s20 + $0x40] sm:$0xff]  ;;  %v211_v18 = vsub.f32 %v190_v6, %v1303_v7  ;;  %v209_v19 = vsub.f32 %v188_v8, %v1303_v7  ;;  %v212_v20 = vsub.f32 %v191_v9, %v1303_v7 }
  0x16   : > { %v1313_v15 = vld [vmem:[%s1300_s20 + $0x48] sm:$0xff]  ;;  %v1319_v17 = vld [vmem:[%s1300_s20 + $0x58] sm:$0xff]  ;;  %v210_v21 = vsub.f32 %v189_v10, %v1303_v7  ;;  %v1326_v22 = vld [vmem:[%s1300_s20 + $0x50] sm:$0xff]  ;;  %v214_v25 = vsub.f32 %v193_v11, %v1303_v7  ;;  %v213_v26 = vsub.f32 %v192_v12, %v1303_v7  ;;  %v216_v27 = vsub.f32 %v195_v13, %v1303_v7 }
  0x17   : > { %v1329_v23 = vld [vmem:[%s1300_s20 + $0x68] sm:$0xff]  ;;  %v1332_v24 = vld [vmem:[%s1300_s20 + $0x60] sm:$0xff]  ;;  %v215_v28 = vsub.f32 %v194_v14, %v1303_v7  ;;  %v218_v29 = vsub.f32 %v1313_v15, %v1303_v7  ;;  %v217_v30 = vsub.f32 %v1316_v16, %v1303_v7  ;;  %v220_v32 = vsub.f32 %v1319_v17, %v1303_v7  ;;  %v203_v0 = vld [vmem:[%s1300_s20 + $0x78] sm:$0xff] }
  0x18   : > { %v219_v33 = vsub.f32 %v1326_v22, %v1303_v7  ;;  %v222_v34 = vsub.f32 %v1329_v23, %v1303_v7  ;;  %v221_v35 = vsub.f32 %v1332_v24, %v1303_v7  ;;  %v202_v1 = vld [vmem:[%s1300_s20 + $0x70] sm:$0xff]  ;;  %v1256_v6 = vmov 0  }
  0x19   : > { %v224_v10 = vsub.f32 %v203_v0, %v1303_v7  ;;  %v223_v11 = vsub.f32 %v202_v1, %v1303_v7 }
  0x1f   : > { %v1342_v31 = vpop.eup %1246 }
  0x20   : > { %v232_v36 = vmul.f32 %v1342_v31, %v211_v18  ;;  %v230_v37 = vmul.f32 %v1342_v31, %v209_v19  ;;  %v233_v38 = vmul.f32 %v1342_v31, %v212_v20  ;;  %v231_v39 = vmul.f32 %v1342_v31, %v210_v21 }
  0x21   : > { %v235_v40 = vmul.f32 %v1342_v31, %v214_v25  ;;  %v234_v41 = vmul.f32 %v1342_v31, %v213_v26  ;;  %v237_v42 = vmul.f32 %v1342_v31, %v216_v27  ;;  %v236_v43 = vmul.f32 %v1342_v31, %v215_v28 }
  0x22   : > { %v265_v44 = vfloor.f32 %v232_v36  ;;  %249 = vst.msk [vmem:[%s1348_s23 + $0x10] sm:$0xff] %vm246_vm0, %v232_v36  ;;  %v263_v45 = vfloor.f32 %v230_v37  ;;  %247 = vst.msk [vmem:[%s1348_s23] sm:$0xff] %vm246_vm0, %v230_v37  ;;  %v266_v46 = vfloor.f32 %v233_v38  ;;  %v264_v47 = vfloor.f32 %v231_v39 }
  0x23   : > { %250 = vst.msk [vmem:[%s1348_s23 + $0x18] sm:$0xff] %vm246_vm0, %v233_v38  ;;  %248 = vst.msk [vmem:[%s1348_s23 + $0x8] sm:$0xff] %vm246_vm0, %v231_v39  ;;  %v268_v48 = vfloor.f32 %v235_v40  ;;  %v267_v49 = vfloor.f32 %v234_v41  ;;  %v270_v50 = vfloor.f32 %v237_v42  ;;  %v269_v51 = vfloor.f32 %v236_v43 }
  0x24   : > { %252 = vst.msk [vmem:[%s1348_s23 + $0x28] sm:$0xff] %vm246_vm0, %v235_v40  ;;  %251 = vst.msk [vmem:[%s1348_s23 + $0x20] sm:$0xff] %vm246_vm0, %v234_v41  ;;  %v1203_v52 = vtrunc.f32 %v265_v44  ;;  %v1199_v53 = vtrunc.f32 %v263_v45  ;;  %v1205_v54 = vtrunc.f32 %v266_v46  ;;  %v1201_v55 = vtrunc.f32 %v264_v47 }
  0x25   : > { %254 = vst.msk [vmem:[%s1348_s23 + $0x38] sm:$0xff] %vm246_vm0, %v237_v42  ;;  %253 = vst.msk [vmem:[%s1348_s23 + $0x30] sm:$0xff] %vm246_vm0, %v236_v43  ;;  %v1209_v56 = vtrunc.f32 %v268_v48  ;;  %v1207_v57 = vtrunc.f32 %v267_v49  ;;  %v1213_v58 = vtrunc.f32 %v270_v50  ;;  %v1211_v59 = vtrunc.f32 %v269_v51 }
  0x26   : > { %v1382_v60 = vcvt.f32.s32 %v1203_v52  ;;  %v1384_v61 = vcvt.f32.s32 %v1199_v53  ;;  %v1386_v62 = vcvt.f32.s32 %v1205_v54  ;;  %v1388_v63 = vcvt.f32.s32 %v1201_v55 }
  0x27   : > { %v1392_v2 = vcvt.f32.s32 %v1209_v56  ;;  %v1394_v3 = vcvt.f32.s32 %v1207_v57  ;;  %v1396_v4 = vcvt.f32.s32 %v1213_v58  ;;  %v1398_v5 = vcvt.f32.s32 %v1211_v59 }
  0x28   : > { %vm297_vm1 = vcmp.ge.s32.totalorder %v1382_v60, 0  ;;  %vm295_vm2 = vcmp.ge.s32.totalorder %v1384_v61, 0  ;;  %vm298_vm3 = vcmp.ge.s32.totalorder %v1386_v62, 0  ;;  %vm296_vm4 = vcmp.ge.s32.totalorder %v1388_v63, 0 }
  0x29   : > { %v1407_v8 = vsel %vm297_vm1, 1, %v1256_v6  ;;  %v1412_v9 = vsel %vm295_vm2, 1, %v1256_v6  ;;  %v1423_v12 = vsel %vm298_vm3, 1, %v1256_v6  ;;  %v1428_v13 = vsel %vm296_vm4, 1, %v1256_v6 }
  0x2a   : > { %363 = vrot.lane.b32.xlu1 %v1407_v8, %s1257_s24  ;;  %359 = vrot.lane.b32.xlu0 %v1412_v9, %s1257_s24  ;;  %vm300_vm5 = vcmp.ge.s32.totalorder %v1392_v2, 0  ;;  %vm299_vm6 = vcmp.ge.s32.totalorder %v1394_v3, 0  ;;  %vm302_vm7 = vcmp.ge.s32.totalorder %v1396_v4, 0  ;;  %vm301_vm8 = vcmp.ge.s32.totalorder %v1398_v5, 0 }
  0x2b   : > { %v239_v14 = vmul.f32 %v1342_v31, %v218_v29  ;;  %v238_v18 = vmul.f32 %v1342_v31, %v217_v30  ;;  %v241_v19 = vmul.f32 %v1342_v31, %v220_v32  ;;  %v240_v20 = vmul.f32 %v1342_v31, %v219_v33 }
  0x2c   : > { %v243_v15 = vmul.f32 %v1342_v31, %v222_v34  ;;  %v242_v16 = vmul.f32 %v1342_v31, %v221_v35  ;;  %v245_v17 = vmul.f32 %v1342_v31, %v224_v10  ;;  %v244_v21 = vmul.f32 %v1342_v31, %v223_v11 }
  0x2d   : > { %256 = vst.msk [vmem:[%s1348_s23 + $0x48] sm:$0xff] %vm246_vm0, %v239_v14  ;;  %v272_v22 = vfloor.f32 %v239_v14  ;;  %255 = vst.msk [vmem:[%s1348_s23 + $0x40] sm:$0xff] %vm246_vm0, %v238_v18  ;;  %v271_v7 = vfloor.f32 %v238_v18  ;;  %v274_v23 = vfloor.f32 %v241_v19  ;;  %v273_v24 = vfloor.f32 %v240_v20 }
  0x2e   : > { %365 = vrot.lane.b32.xlu1 %v1423_v12, %s1257_s24  ;;  %361 = vrot.lane.b32.xlu0 %v1428_v13, %s1257_s24  ;;  %258 = vst.msk [vmem:[%s1348_s23 + $0x58] sm:$0xff] %vm246_vm0, %v241_v19  ;;  %257 = vst.msk [vmem:[%s1348_s23 + $0x50] sm:$0xff] %vm246_vm0, %v240_v20  ;;  %v1475_v25 = vsel %vm300_vm5, 1, %v1256_v6  ;;  %v1480_v26 = vsel %vm299_vm6, 1, %v1256_v6  ;;  %v276_v27 = vfloor.f32 %v243_v15  ;;  %v275_v28 = vfloor.f32 %v242_v16 }
  0x2f   : > { %260 = vst.msk [vmem:[%s1348_s23 + $0x68] sm:$0xff] %vm246_vm0, %v243_v15  ;;  %259 = vst.msk [vmem:[%s1348_s23 + $0x60] sm:$0xff] %vm246_vm0, %v242_v16  ;;  %v1217_v29 = vtrunc.f32 %v272_v22  ;;  %v1215_v30 = vtrunc.f32 %v271_v7  ;;  %v1221_v31 = vtrunc.f32 %v274_v23  ;;  %v1219_v32 = vtrunc.f32 %v273_v24 }
  0x30   : > { %262 = vst.msk [vmem:[%s1348_s23 + $0x78] sm:$0xff] %vm246_vm0, %v245_v17  ;;  %261 = vst.msk [vmem:[%s1348_s23 + $0x70] sm:$0xff] %vm246_vm0, %v244_v21  ;;  %v1497_v33 = vsel %vm302_vm7, 1, %v1256_v6  ;;  %v1502_v34 = vsel %vm301_vm8, 1, %v1256_v6  ;;  %v1225_v37 = vtrunc.f32 %v276_v27  ;;  %v1223_v38 = vtrunc.f32 %v275_v28 }
  0x31   : > { %v1504_v35 = vcvt.f32.s32 %v1217_v29  ;;  %v1506_v36 = vcvt.f32.s32 %v1215_v30  ;;  %v278_v39 = vfloor.f32 %v245_v17  ;;  %v277_v40 = vfloor.f32 %v244_v21 }
  0x32   : > { %369 = vrot.lane.b32.xlu1 %v1475_v25, %s1257_s24  ;;  %367 = vrot.lane.b32.xlu0 %v1480_v26, %s1257_s24  ;;  %v1510_v41 = vcvt.f32.s32 %v1221_v31  ;;  %v1512_v42 = vcvt.f32.s32 %v1219_v32  ;;  %v1530_v47 = vcvt.f32.s32 %v1225_v37  ;;  %v1532_v48 = vcvt.f32.s32 %v1223_v38 }
  0x33   : > { %vm2895_vm9 = vcmp.ge.s32.totalorder %v1504_v35, 0  ;;  %vm2893_vm10 = vcmp.ge.s32.totalorder %v1506_v36, 0  ;;  %v1229_v45 = vtrunc.f32 %v278_v39  ;;  %v1227_v46 = vtrunc.f32 %v277_v40 }
  0x34   : > { %v1521_v43 = vsel %vm2895_vm9, 1, %v1256_v6  ;;  %v1526_v44 = vsel %vm2893_vm10, 1, %v1256_v6  ;;  %vm2892_vm11 = vcmp.ge.s32.totalorder %v1510_v41, 0  ;;  %vm2891_vm12 = vcmp.ge.s32.totalorder %v1512_v42, 0 }
  0x35   : > { %v1541_v49 = vsel %vm2892_vm11, 1, %v1256_v6  ;;  %v1546_v50 = vsel %vm2891_vm12, 1, %v1256_v6  ;;  %vm2890_vm13 = vcmp.ge.s32.totalorder %v1530_v47, 0  ;;  %vm2889_vm14 = vcmp.ge.s32.totalorder %v1532_v48, 0 }
  0x36   : > { %373 = vrot.lane.b32.xlu1 %v1497_v33, %s1257_s24  ;;  %371 = vrot.lane.b32.xlu0 %v1502_v34, %s1257_s24  ;;  %v1550_v51 = vcvt.f32.s32 %v1229_v45  ;;  %v1552_v52 = vcvt.f32.s32 %v1227_v46  ;;  %v1561_v53 = vsel %vm2890_vm13, 1, %v1256_v6  ;;  %v1566_v54 = vsel %vm2889_vm14, 1, %v1256_v6 }
  0x37   : > { %vm424_vm14 = vcmp.lt.s32.totalorder %v1388_v63, 8  ;;  %vm423_vm13 = vcmp.lt.s32.totalorder %v1384_v61, 8  ;;  %vm426_vm12 = vcmp.lt.s32.totalorder %v1386_v62, 8  ;;  %vm425_vm11 = vcmp.lt.s32.totalorder %v1382_v60, 8 }
  0x38   : > { %2921 = vst [vmem:[#allocation2_spill] sm:$0xff] %v1550_v51  ;;  %2922 = vst [vmem:[#allocation3_spill] sm:$0xff] %v1552_v52  ;;  %vm2901_vm15 = vcmp.ge.s32.totalorder %v1550_v51, 0  ;;  %vm2894_vm0 = vcmp.ge.s32.totalorder %v1552_v52, 0  ;;  %v440_v57 = vsel %vm424_vm14, 1, %v1256_v6  ;;  %v439_v58 = vsel %vm423_vm13, 1, %v1256_v6 }
  0x39   : > { %v1577_v55 = vsel %vm2901_vm15, 1, %v1256_v6  ;;  %v1582_v56 = vsel %vm2894_vm0, 1, %v1256_v6  ;;  %v442_v59 = vsel %vm426_vm12, 1, %v1256_v6  ;;  %v441_v0 = vsel %vm425_vm11, 1, %v1256_v6 }
  0x3a   : > { %377 = vrot.lane.b32.xlu1 %v1521_v43, %s1257_s24  ;;  %375 = vrot.lane.b32.xlu0 %v1526_v44, %s1257_s24  ;;  %vm428_vm10 = vcmp.lt.s32.totalorder %v1392_v2, 8  ;;  %vm427_vm0 = vcmp.lt.s32.totalorder %v1394_v3, 8  ;;  %vm430_vm13 = vcmp.lt.s32.totalorder %v1396_v4, 8  ;;  %vm429_vm14 = vcmp.lt.s32.totalorder %v1398_v5, 8 }
  0x3b   : > { %v444_v1 = vsel %vm428_vm10, 1, %v1256_v6  ;;  %v443_v10 = vsel %vm427_vm0, 1, %v1256_v6  ;;  %v446_v11 = vsel %vm430_vm13, 1, %v1256_v6  ;;  %v445_v14 = vsel %vm429_vm14, 1, %v1256_v6 }
  0x3c   : > { %vm432_vm11 = vcmp.lt.s32.totalorder %v1504_v35, 8  ;;  %vm431_vm12 = vcmp.lt.s32.totalorder %v1506_v36, 8  ;;  %vm434_vm10 = vcmp.lt.s32.totalorder %v1510_v41, 8  ;;  %vm433_vm0 = vcmp.lt.s32.totalorder %v1512_v42, 8 }
  0x3d   : > { %v448_v18 = vsel %vm432_vm11, 1, %v1256_v6  ;;  %v447_v19 = vsel %vm431_vm12, 1, %v1256_v6  ;;  %v450_v20 = vsel %vm434_vm10, 1, %v1256_v6  ;;  %v449_v15 = vsel %vm433_vm0, 1, %v1256_v6 }
  0x3e   : > { %381 = vrot.lane.b32.xlu1 %v1541_v49, %s1257_s24  ;;  %379 = vrot.lane.b32.xlu0 %v1546_v50, %s1257_s24  ;;  %vm436_vm13 = vcmp.lt.s32.totalorder %v1530_v47, 8  ;;  %vm435_vm14 = vcmp.lt.s32.totalorder %v1532_v48, 8  ;;  %vm438_vm11 = vcmp.lt.s32.totalorder %v1550_v51, 8  ;;  %vm437_vm12 = vcmp.lt.s32.totalorder %v1552_v52, 8 }
  0x3f   : > { %v452_v16 = vsel %vm436_vm13, 1, %v1256_v6  ;;  %v451_v17 = vsel %vm435_vm14, 1, %v1256_v6  ;;  %v454_v21 = vsel %vm438_vm11, 1, %v1256_v6  ;;  %v453_v22 = vsel %vm437_vm12, 1, %v1256_v6 }
  0x40   : > { %vm584_vm10 = vcmp.lt.s32.totalorder %v1388_v63, 4  ;;  %vm583_vm0 = vcmp.lt.s32.totalorder %v1384_v61, 4  ;;  %vm586_vm13 = vcmp.lt.s32.totalorder %v1386_v62, 4  ;;  %vm585_vm14 = vcmp.lt.s32.totalorder %v1382_v60, 4 }
  0x41   : > { %v600_v7 = vsel %vm584_vm10, 1, %v1256_v6  ;;  %v599_v23 = vsel %vm583_vm0, 1, %v1256_v6  ;;  %v602_v24 = vsel %vm586_vm13, 1, %v1256_v6  ;;  %v601_v27 = vsel %vm585_vm14, 1, %v1256_v6 }
  0x42   : > { %385 = vrot.lane.b32.xlu1 %v1561_v53, %s1257_s24  ;;  %383 = vrot.lane.b32.xlu0 %v1566_v54, %s1257_s24  ;;  %vm588_vm11 = vcmp.lt.s32.totalorder %v1392_v2, 4  ;;  %vm587_vm12 = vcmp.lt.s32.totalorder %v1394_v3, 4  ;;  %vm590_vm10 = vcmp.lt.s32.totalorder %v1396_v4, 4  ;;  %vm589_vm0 = vcmp.lt.s32.totalorder %v1398_v5, 4 }
  0x43   : > { %v604_v28 = vsel %vm588_vm11, 1, %v1256_v6  ;;  %v603_v29 = vsel %vm587_vm12, 1, %v1256_v6  ;;  %v606_v30 = vsel %vm590_vm10, 1, %v1256_v6  ;;  %v605_v31 = vsel %vm589_vm0, 1, %v1256_v6 }
  0x44   : > { %vm592_vm13 = vcmp.lt.s32.totalorder %v1504_v35, 4  ;;  %vm591_vm14 = vcmp.lt.s32.totalorder %v1506_v36, 4  ;;  %vm594_vm11 = vcmp.lt.s32.totalorder %v1510_v41, 4  ;;  %vm593_vm12 = vcmp.lt.s32.totalorder %v1512_v42, 4 }
  0x45   : > { %v608_v32 = vsel %vm592_vm13, 1, %v1256_v6  ;;  %v607_v37 = vsel %vm591_vm14, 1, %v1256_v6  ;;  %v610_v38 = vsel %vm594_vm11, 1, %v1256_v6  ;;  %v609_v39 = vsel %vm593_vm12, 1, %v1256_v6 }
  0x46   : > { %389 = vrot.lane.b32.xlu1 %v1577_v55, %s1257_s24  ;;  %387 = vrot.lane.b32.xlu0 %v1582_v56, %s1257_s24  ;;  %vm596_vm10 = vcmp.lt.s32.totalorder %v1530_v47, 4  ;;  %vm595_vm0 = vcmp.lt.s32.totalorder %v1532_v48, 4  ;;  %vm598_vm13 = vcmp.lt.s32.totalorder %v1550_v51, 4  ;;  %vm597_vm14 = vcmp.lt.s32.totalorder %v1552_v52, 4 }
  0x47   : > { %v612_v46 = vsel %vm596_vm10, 1, %v1256_v6  ;;  %vm744_vm11 = vcmp.lt.s32.totalorder %v1388_v63, 2  ;;  %vm743_vm12 = vcmp.lt.s32.totalorder %v1384_v61, 2  ;;  %vm746_vm10 = vcmp.lt.s32.totalorder %v1386_v62, 2 }
  0x48   : > { %vm316_vm9 = vcmp.lt.s32.totalorder %v1392_v2, 16 }
  0x4a   : > { %457 = vrot.lane.b32.xlu1 %v440_v57, %s1257_s24  ;;  %455 = vrot.lane.b32.xlu0 %v439_v58, %s1257_s24  ;;  %v611_v57 = vsel %vm595_vm0, 1, %v1256_v6  ;;  %vm745_vm0 = vcmp.lt.s32.totalorder %v1382_v60, 2 }
  0x4e   : > { %461 = vrot.lane.b32.xlu1 %v442_v59, %s1257_s24  ;;  %459 = vrot.lane.b32.xlu0 %v441_v0, %s1257_s24  ;;  %v614_v0 = vsel %vm598_vm13, 1, %v1256_v6  ;;  %vm748_vm13 = vcmp.lt.s32.totalorder %v1392_v2, 2 }
  0x52   : > { %465 = vrot.lane.b32.xlu1 %v444_v1, %s1257_s24  ;;  %463 = vrot.lane.b32.xlu0 %v443_v10, %s1257_s24  ;;  %v613_v1 = vsel %vm597_vm14, 1, %v1256_v6  ;;  %vm747_vm14 = vcmp.lt.s32.totalorder %v1394_v3, 2 }
  0x56   : > { %469 = vrot.lane.b32.xlu1 %v446_v11, %s1257_s24  ;;  %467 = vrot.lane.b32.xlu0 %v445_v14, %s1257_s24 }
  0x5a   : > { %473 = vrot.lane.b32.xlu1 %v448_v18, %s1257_s24  ;;  %471 = vrot.lane.b32.xlu0 %v447_v19, %s1257_s24 }
  0x5e   : > { %477 = vrot.lane.b32.xlu1 %v450_v20, %s1257_s24  ;;  %475 = vrot.lane.b32.xlu0 %v449_v15, %s1257_s24 }
  0x62   : > { %481 = vrot.lane.b32.xlu1 %v452_v16, %s1257_s24  ;;  %479 = vrot.lane.b32.xlu0 %v451_v17, %s1257_s24 }
  0x66   : > { %485 = vrot.lane.b32.xlu1 %v454_v21, %s1257_s24  ;;  %483 = vrot.lane.b32.xlu0 %v453_v22, %s1257_s24  ;;  %v764_v22 = vsel %vm748_vm13, 1, %v1256_v6  ;;  %vm754_vm13 = vcmp.lt.s32.totalorder %v1510_v41, 2 }
  0x6a   : > { %521 = vrot.lane.b32.xlu1 %v1428_v13, %s1258_s25  ;;  %519 = vrot.lane.b32.xlu0 %v1412_v9, %s1258_s25 }
  0x6e   : > { %525 = vrot.lane.b32.xlu1 %v1423_v12, %s1258_s25  ;;  %523 = vrot.lane.b32.xlu0 %v1407_v8, %s1258_s25 }
  0x72   : > { %529 = vrot.lane.b32.xlu1 %v1475_v25, %s1258_s25  ;;  %527 = vrot.lane.b32.xlu0 %v1480_v26, %s1258_s25 }
  0x76   : > { %533 = vrot.lane.b32.xlu1 %v1497_v33, %s1258_s25  ;;  %531 = vrot.lane.b32.xlu0 %v1502_v34, %s1258_s25 }
  0x7a   : > { %537 = vrot.lane.b32.xlu1 %v1521_v43, %s1258_s25  ;;  %535 = vrot.lane.b32.xlu0 %v1526_v44, %s1258_s25 }
  0x7e   : > { %541 = vrot.lane.b32.xlu1 %v1541_v49, %s1258_s25  ;;  %539 = vrot.lane.b32.xlu0 %v1546_v50, %s1258_s25 }
  0x82   : > { %545 = vrot.lane.b32.xlu1 %v1561_v53, %s1258_s25  ;;  %543 = vrot.lane.b32.xlu0 %v1566_v54, %s1258_s25 }
  0x86   : > { %549 = vrot.lane.b32.xlu1 %v1577_v55, %s1258_s25  ;;  %547 = vrot.lane.b32.xlu0 %v1582_v56, %s1258_s25 }
  0x8a   : > { %617 = vrot.lane.b32.xlu1 %v600_v7, %s1258_s25  ;;  %615 = vrot.lane.b32.xlu0 %v599_v23, %s1258_s25  ;;  %v763_v7 = vsel %vm747_vm14, 1, %v1256_v6  ;;  %vm753_vm14 = vcmp.lt.s32.totalorder %v1512_v42, 2 }
  0x8e   : > { %621 = vrot.lane.b32.xlu1 %v602_v24, %s1258_s25  ;;  %619 = vrot.lane.b32.xlu0 %v601_v27, %s1258_s25 }
  0x92   : > { %625 = vrot.lane.b32.xlu1 %v604_v28, %s1258_s25  ;;  %623 = vrot.lane.b32.xlu0 %v603_v29, %s1258_s25 }
  0x96   : > { %629 = vrot.lane.b32.xlu1 %v606_v30, %s1258_s25  ;;  %627 = vrot.lane.b32.xlu0 %v605_v31, %s1258_s25 }
  0x9a   : > { %633 = vrot.lane.b32.xlu1 %v608_v32, %s1258_s25  ;;  %631 = vrot.lane.b32.xlu0 %v607_v37, %s1258_s25 }
  0x9c   : > { %v1702_v40 = vpop.permute.xlu1 %363  ;;  %v1704_v45 = vpop.permute.xlu0 %359 }
  0x9e   : > { %637 = vrot.lane.b32.xlu1 %v610_v38, %s1258_s25  ;;  %635 = vrot.lane.b32.xlu0 %v609_v39, %s1258_s25  ;;  %v770_v39 = vsel %vm754_vm13, 1, %v1256_v6  ;;  %vm313_vm13 = vcmp.lt.s32.totalorder %v1382_v60, 16 }
  0xa0   : > { %v1712_v58 = vpop.permute.xlu1 %365  ;;  %v1714_v59 = vpop.permute.xlu0 %361 }
  0xa2   : > { %641 = vrot.lane.b32.xlu1 %v612_v46, %s1258_s25  ;;  %639 = vrot.lane.b32.xlu0 %v611_v57, %s1258_s25  ;;  %v769_v46 = vsel %vm753_vm14, 1, %v1256_v6  ;;  %vm311_vm14 = vcmp.lt.s32.totalorder %v1384_v61, 16 }
  0xa4   : > { %v1722_v10 = vpop.permute.xlu1 %369  ;;  %v1724_v11 = vpop.permute.xlu0 %367 }
  0xa6   : > { %645 = vrot.lane.b32.xlu1 %v614_v0, %s1258_s25  ;;  %643 = vrot.lane.b32.xlu0 %v613_v1, %s1258_s25 }
  0xa8   : > { %v1728_v14 = vpop.permute.xlu1 %373  ;;  %v1730_v18 = vpop.permute.xlu0 %371 }
  0xaa   : > { %681 = vrot.lane.b32.xlu1 %v1428_v13, %s1259_s26  ;;  %679 = vrot.lane.b32.xlu0 %v1412_v9, %s1259_s26 }
  0xac   : > { %v1736_v19 = vpop.permute.xlu1 %377  ;;  %v1738_v20 = vpop.permute.xlu0 %375 }
  0xae   : > { %685 = vrot.lane.b32.xlu1 %v1423_v12, %s1259_s26  ;;  %683 = vrot.lane.b32.xlu0 %v1407_v8, %s1259_s26 }
  0xb0   : > { %v1744_v15 = vpop.permute.xlu1 %381  ;;  %v1746_v16 = vpop.permute.xlu0 %379 }
  0xb2   : > { %689 = vrot.lane.b32.xlu1 %v1475_v25, %s1259_s26  ;;  %687 = vrot.lane.b32.xlu0 %v1480_v26, %s1259_s26 }
  0xb4   : > { %v1752_v9 = vpop.permute.xlu1 %385  ;;  %v1754_v13 = vpop.permute.xlu0 %383 }
  0xb6   : > { %693 = vrot.lane.b32.xlu1 %v1497_v33, %s1259_s26  ;;  %691 = vrot.lane.b32.xlu0 %v1502_v34, %s1259_s26 }
  0xb8   : > { %v1760_v8 = vpop.permute.xlu1 %389  ;;  %v1762_v12 = vpop.permute.xlu0 %387 }
  0xba   : > { %697 = vrot.lane.b32.xlu1 %v1521_v43, %s1259_s26  ;;  %695 = vrot.lane.b32.xlu0 %v1526_v44, %s1259_s26 }
  0xbc   : > { %v1768_v25 = vpop.permute.xlu1 %457  ;;  %v1770_v26 = vpop.permute.xlu0 %455 }
  0xbe   : > { %701 = vrot.lane.b32.xlu1 %v1541_v49, %s1259_s26  ;;  %699 = vrot.lane.b32.xlu0 %v1546_v50, %s1259_s26  ;;  %v760_v49 = vsel %vm744_vm11, 1, %v1256_v6  ;;  %v759_v50 = vsel %vm743_vm12, 1, %v1256_v6  ;;  %vm750_vm11 = vcmp.lt.s32.totalorder %v1396_v4, 2  ;;  %vm749_vm12 = vcmp.lt.s32.totalorder %v1398_v5, 2 }
  0xbf   : > { %v766_v27 = vsel %vm750_vm11, 1, %v1256_v6  ;;  %v765_v28 = vsel %vm749_vm12, 1, %v1256_v6  ;;  %vm756_vm11 = vcmp.lt.s32.totalorder %v1530_v47, 2  ;;  %vm755_vm12 = vcmp.lt.s32.totalorder %v1532_v48, 2 }
  0xc0   : > { %v1776_v33 = vpop.permute.xlu1 %461  ;;  %v1778_v34 = vpop.permute.xlu0 %459  ;;  %v772_v1 = vsel %vm756_vm11, 1, %v1256_v6  ;;  %vm314_vm11 = vcmp.lt.s32.totalorder %v1386_v62, 16 }
  0xc2   : > { %705 = vrot.lane.b32.xlu1 %v1561_v53, %s1259_s26  ;;  %703 = vrot.lane.b32.xlu0 %v1566_v54, %s1259_s26 }
  0xc4   : > { %v1784_v43 = vpop.permute.xlu1 %465  ;;  %v1786_v44 = vpop.permute.xlu0 %463 }
  0xc6   : > { %709 = vrot.lane.b32.xlu1 %v1577_v55, %s1259_s26  ;;  %707 = vrot.lane.b32.xlu0 %v1582_v56, %s1259_s26  ;;  %v762_v55 = vsel %vm746_vm10, 1, %v1256_v6  ;;  %v761_v56 = vsel %vm745_vm0, 1, %v1256_v6  ;;  %vm752_vm10 = vcmp.lt.s32.totalorder %v1504_v35, 2  ;;  %vm751_vm0 = vcmp.lt.s32.totalorder %v1506_v36, 2 }
  0xc7   : > { %v768_v31 = vsel %vm752_vm10, 1, %v1256_v6  ;;  %v767_v32 = vsel %vm751_vm0, 1, %v1256_v6  ;;  %vm758_vm10 = vcmp.lt.s32.totalorder %v1550_v51, 2  ;;  %vm757_vm0 = vcmp.lt.s32.totalorder %v1552_v52, 2 }
  0xc8   : > { %v1796_v53 = vpop.permute.xlu1 %469  ;;  %v1798_v54 = vpop.permute.xlu0 %467 }
  0xca   : > { %777 = vrot.lane.b32.xlu1 %v760_v49, %s1259_s26  ;;  %775 = vrot.lane.b32.xlu0 %v759_v50, %s1259_s26  ;;  %v771_v49 = vsel %vm755_vm12, 1, %v1256_v6  ;;  %vm1921_vm12 = vmand %vm297_vm1, %vm313_vm13  ;;  %vm315_vm13 = vcmp.lt.s32.totalorder %v1394_v3, 16 }
  0xcb   : > { %vm1939_vm1 = vmand %vm298_vm3, %vm314_vm11  ;;  %vm317_vm11 = vcmp.lt.s32.totalorder %v1398_v5, 16 }
  0xcc   : > { %v1806_v17 = vpop.permute.xlu1 %473  ;;  %v1808_v21 = vpop.permute.xlu0 %471  ;;  %vm1957_vm3 = vmand %vm300_vm5, %vm316_vm9  ;;  %vm320_vm9 = vcmp.lt.s32.totalorder %v1504_v35, 16 }
  0xcd   : > { %vm1984_vm15 = vmand %vm301_vm8, %vm317_vm11  ;;  %vm2958_vm11 = vcmp.ge.s32.totalorder %v1504_v35, 0  ;;  %vm395_vm8 = vcmp.ne.s32.totalorder %v1724_v11, 0  ;;  %v3165_v11 = vmov 0 }
  0xce   : > { %781 = vrot.lane.b32.xlu1 %v762_v55, %s1259_s26  ;;  %779 = vrot.lane.b32.xlu0 %v761_v56, %s1259_s26  ;;  %v774_v56 = vsel %vm758_vm10, 1, %v1256_v6  ;;  %vm312_vm10 = vcmp.lt.s32.totalorder %v1388_v63, 16 }
  0xd0   : > { %v1816_v23 = vpop.permute.xlu1 %477  ;;  %v1818_v24 = vpop.permute.xlu0 %475 }
  0xd1   : > { %2923 = vst [vmem:[#allocation4_spill] sm:$0xff] %v1816_v23  ;;  %2924 = vst [vmem:[#allocation5_spill] sm:$0xff] %v1818_v24 }
  0xd2   : > { %785 = vrot.lane.b32.xlu1 %v764_v22, %s1259_s26  ;;  %783 = vrot.lane.b32.xlu0 %v763_v7, %s1259_s26  ;;  %v773_v22 = vsel %vm757_vm0, 1, %v1256_v6  ;;  %vm1928_vm0 = vmand %vm295_vm2, %vm311_vm14  ;;  %vm318_vm14 = vcmp.lt.s32.totalorder %v1396_v4, 16 }
  0xd3   : > { %vm1946_vm2 = vmand %vm296_vm4, %vm312_vm10  ;;  %vm326_vm10 = vcmp.lt.s32.totalorder %v1550_v51, 16 }
  0xd4   : > { %v1826_v29 = vpop.permute.xlu1 %481  ;;  %v1828_v30 = vpop.permute.xlu0 %479  ;;  %vm1964_vm4 = vmand %vm299_vm6, %vm315_vm13  ;;  %vm325_vm6 = vcmp.lt.s32.totalorder %v1552_v52, 16  ;;  %vm391_vm13 = vcmp.ne.s32.totalorder %v1704_v45, 0 }
  0xd5   : > { %2925 = vst [vmem:[#allocation6_spill] sm:$0xff] %v1826_v29  ;;  %2926 = vst [vmem:[#allocation7_spill] sm:$0xff] %v1828_v30 }
  0xd6   : > { %789 = vrot.lane.b32.xlu1 %v766_v27, %s1259_s26  ;;  %787 = vrot.lane.b32.xlu0 %v765_v28, %s1259_s26  ;;  %vm1975_vm5 = vmand %vm302_vm7, %vm318_vm14  ;;  %vm393_vm7 = vcmp.ne.s32.totalorder %v1702_v40, 0  ;;  %vm394_vm14 = vcmp.ne.s32.totalorder %v1712_v58, 0  ;;  %v3059_v40 = vmov 0 }
  0xd8   : > { %v1836_v37 = vpop.permute.xlu1 %485  ;;  %v1838_v38 = vpop.permute.xlu0 %483 }
  0xda   : > { %793 = vrot.lane.b32.xlu1 %v768_v31, %s1259_s26  ;;  %791 = vrot.lane.b32.xlu0 %v767_v32, %s1259_s26 }
  0xdc   : > { %v1846_v57 = vpop.permute.xlu1 %521  ;;  %v1848_v0 = vpop.permute.xlu0 %519 }
  0xde   : > { %797 = vrot.lane.b32.xlu1 %v770_v39, %s1259_s26  ;;  %795 = vrot.lane.b32.xlu0 %v769_v46, %s1259_s26 }
  0xe0   : > { %v1856_v50 = vpop.permute.xlu1 %525  ;;  %v1858_v55 = vpop.permute.xlu0 %523 }
  0xe2   : > { %801 = vrot.lane.b32.xlu1 %v772_v1, %s1259_s26  ;;  %799 = vrot.lane.b32.xlu0 %v771_v49, %s1259_s26 }
  0xe4   : > { %v1866_v7 = vpop.permute.xlu1 %529  ;;  %v1868_v27 = vpop.permute.xlu0 %527 }
  0xe6   : > { %805 = vrot.lane.b32.xlu1 %v774_v56, %s1259_s26  ;;  %803 = vrot.lane.b32.xlu0 %v773_v22, %s1259_s26 }
  0xe8   : > { %v1872_v28 = vpop.permute.xlu1 %533  ;;  %v1874_v31 = vpop.permute.xlu0 %531 }
  0xe9   : > { %2927 = vst [vmem:[#allocation8_spill] sm:$0xff] %v1872_v28  ;;  %2928 = vst [vmem:[#allocation9_spill] sm:$0xff] %v1874_v31  ;;  %v2946_v31 = vmov 0  ;;  %v2948_v28 = vmov 0 }
  0xea   : > { %857 = vrot.lane.b32.xlu1 %v1388_v63, %s1260_s27  ;;  %855 = vrot.lane.b32.xlu0 %v1384_v61, %s1260_s27  ;;  %v2947_v31 = vsel %vm1957_vm3, 4294967295, %v2946_v31  ;;  %v2949_v28 = vsel %vm1964_vm4, 4294967295, %v2948_v28  ;;  %vm319_vm4 = vcmp.lt.s32.totalorder %v1506_v36, 16 }
  0xec   : > { %v1880_v6 = vpop.permute.xlu1 %537  ;;  %v1882_v32 = vpop.permute.xlu0 %535 }
  0xed   : > { %2929 = vst [vmem:[#allocation10_spill] sm:$0xff] %v1880_v6  ;;  %2930 = vst [vmem:[#allocation11_spill] sm:$0xff] %v1882_v32  ;;  %v2940_v32 = vmov 0  ;;  %v2942_v6 = vmov 0 }
  0xee   : > { %861 = vrot.lane.b32.xlu1 %v1386_v62, %s1260_s27  ;;  %859 = vrot.lane.b32.xlu0 %v1382_v60, %s1260_s27  ;;  %v2941_v32 = vsel %vm1939_vm1, 4294967295, %v2940_v32  ;;  %v2943_v6 = vsel %vm1946_vm2, 4294967295, %v2942_v6  ;;  %vm2961_vm2 = vcmp.ge.s32.totalorder %v1552_v52, 0 }
  0xef   : > { %vm2010_vm1 = vmand %vm2961_vm2, %vm325_vm6  ;;  %vm322_vm6 = vcmp.lt.s32.totalorder %v1510_v41, 16 }
  0xf0   : > { %v1888_v39 = vpop.permute.xlu1 %541  ;;  %v1890_v46 = vpop.permute.xlu0 %539 }
  0xf1   : > { %2931 = vst [vmem:[#allocation12_spill] sm:$0xff] %v1888_v39  ;;  %2932 = vst [vmem:[#allocation13_spill] sm:$0xff] %v1890_v46  ;;  %v2972_v39 = vmov 0  ;;  %v3078_v46 = vmov 0 }
  0xf2   : > { %865 = vrot.lane.b32.xlu1 %v1392_v2, %s1260_s27  ;;  %863 = vrot.lane.b32.xlu0 %v1394_v3, %s1260_s27 }
  0xf4   : > { %v1896_v1 = vpop.permute.xlu1 %545  ;;  %v1898_v49 = vpop.permute.xlu0 %543  ;;  %v3123_v45 = vld [vmem:[#allocation10_spill] sm:$0xff] }
  0xf5   : > { %2933 = vst [vmem:[#allocation14_spill] sm:$0xff] %v1896_v1  ;;  %2934 = vst [vmem:[#allocation15_spill] sm:$0xff] %v1898_v49 }
  0xf6   : > { %869 = vrot.lane.b32.xlu1 %v1396_v4, %s1260_s27  ;;  %867 = vrot.lane.b32.xlu0 %v1398_v5, %s1260_s27 }
  0xf8   : > { %v1904_v56 = vpop.permute.xlu1 %549  ;;  %v1906_v22 = vpop.permute.xlu0 %547 }
  0xfa   : > { %873 = vrot.lane.b32.xlu1 %v1504_v35, %s1260_s27  ;;  %871 = vrot.lane.b32.xlu0 %v1506_v36, %s1260_s27 }
  0xfc   : > { %v1915_v49 = vpop.permute.xlu1 %617  ;;  %v1917_v1 = vpop.permute.xlu0 %615 }
  0xfd   : > { %2935 = vst [vmem:[#allocation16_spill] sm:$0xff] %v1917_v1  ;;  %v2959_v1 = vmov 0 }
  0xfe   : > { %877 = vrot.lane.b32.xlu1 %v1510_v41, %s1260_s27  ;;  %875 = vrot.lane.b32.xlu0 %v1512_v42, %s1260_s27 }
 0x100   : > { %v1951_v30 = vpop.permute.xlu1 %621  ;;  %v1953_v29 = vpop.permute.xlu0 %619 }
 0x101   : > { %2944 = vst [vmem:[#allocation17_spill] sm:$0xff] %v1951_v30  ;;  %2945 = vst [vmem:[#allocation18_spill] sm:$0xff] %v1953_v29  ;;  %v2950_v29 = vmov 0  ;;  %v2952_v30 = vmov 0 }
 0x102   : > { %881 = vrot.lane.b32.xlu1 %v1530_v47, %s1260_s27  ;;  %879 = vrot.lane.b32.xlu0 %v1532_v48, %s1260_s27  ;;  %v2951_v29 = vsel %vm1975_vm5, 4294967295, %v2950_v29  ;;  %v2953_v30 = vsel %vm1984_vm15, 4294967295, %v2952_v30  ;;  %vm2955_vm5 = vcmp.ge.s32.totalorder %v1550_v51, 0  ;;  %vm2004_vm15 = vmand %vm2958_vm11, %vm320_vm9  ;;  %vm2966_vm9 = vcmp.ge.s32.totalorder %v1506_v36, 0 }
 0x103   : > { %vm1997_vm3 = vmand %vm2955_vm5, %vm326_vm10  ;;  %v2960_v1 = vsel %vm2004_vm15, 4294967295, %v2959_v1  ;;  %vm396_vm5 = vcmp.ne.s32.totalorder %v1722_v10, 0  ;;  %vm2981_vm15 = vcmp.ge.s32.totalorder %v1510_v41, 0 }
 0x104   : > { %v1989_v24 = vpop.permute.xlu1 %625  ;;  %v1991_v23 = vpop.permute.xlu0 %623  ;;  %vm2020_vm10 = vmand %vm1928_vm0, %vm391_vm13  ;;  %vm2971_vm0 = vnez %v2941_v32 }
 0x105   : > { %2954 = vst [vmem:[#allocation19_spill] sm:$0xff] %v1991_v23  ;;  %vm2027_vm2 = vmand %vm2966_vm9, %vm319_vm4  ;;  %v2967_v23 = vmov 0  ;;  %vm321_vm4 = vcmp.lt.s32.totalorder %v1512_v42, 16  ;;  %vm2974_vm9 = vcmp.ne.s32.totalorder %v1714_v59, 0  ;;  %v2982_v59 = vmov 0 }
 0x106   : > { %885 = vrot.lane.b32.xlu1 %v1550_v51, %s1260_s27  ;;  %883 = vrot.lane.b32.xlu0 %v1552_v52, %s1260_s27  ;;  %v2968_v23 = vsel %vm2027_vm2, 4294967295, %v2967_v23  ;;  %vm2034_vm11 = vmand %vm1921_vm12, %vm393_vm7  ;;  %v2969_v52 = vmov 0  ;;  %vm2975_vm12 = vnez %v2943_v6 }
 0x107   : > { %v2970_v52 = vsel %vm2034_vm11, 4294967295, %v2969_v52  ;;  %vm2040_vm13 = vmand %vm2971_vm0, %vm394_vm14  ;;  %vm406_vm14 = vcmp.ne.s32.totalorder %v1760_v8, 0  ;;  %vm2978_vm0 = vnez %v2947_v31  ;;  %v2988_v31 = vmov 0 }
 0x108   : > { %v2973_v39 = vsel %vm2040_vm13, 4294967295, %v2972_v39  ;;  %v2046_v10 = vpop.permute.xlu1 %629  ;;  %v2048_v51 = vpop.permute.xlu0 %627  ;;  %vm2054_vm7 = vmand %vm2975_vm12, %vm2974_vm9  ;;  %vm324_vm9 = vcmp.lt.s32.totalorder %v1530_v47, 16  ;;  %vm488_vm11 = vcmp.ne.s32.totalorder %v1768_v25, 0  ;;  %v2994_v25 = vmov 0  ;;  %v3099_v32 = vld [vmem:[#allocation17_spill] sm:$0xff] }
 0x109   : > { %vm2061_vm2 = vmand %vm2978_vm0, %vm396_vm5  ;;  %vm2984_vm5 = vnez %v2949_v28  ;;  %v2990_v28 = vmov 0  ;;  %v3094_v8 = vmov 0 }
 0x10a   : > { %vm2068_vm13 = vmand %vm2981_vm15, %vm322_vm6  ;;  %921 = vrot.lane.b32.xlu1 %v1388_v63, %s1261_s28  ;;  %919 = vrot.lane.b32.xlu0 %v1384_v61, %s1261_s28  ;;  %vm397_vm15 = vcmp.ne.s32.totalorder %v1730_v18, 0  ;;  %vm2987_vm6 = vcmp.ge.s32.totalorder %v1512_v42, 0 }
 0x10b   : > { %v2983_v59 = vsel %vm2068_vm13, 4294967295, %v2982_v59  ;;  %vm2079_vm12 = vmand %vm2984_vm5, %vm395_vm8  ;;  %vm2996_vm13 = vcmp.ne.s32.totalorder %v1762_v12, 0  ;;  %vm2999_vm5 = vnez %v2953_v30  ;;  %v3003_v12 = vmov 0 }
 0x10c   : > { %vm2086_vm0 = vmand %vm2987_vm6, %vm321_vm4  ;;  %v2100_v18 = vpop.permute.xlu1 %633  ;;  %v2102_v6 = vpop.permute.xlu0 %631  ;;  %vm2992_vm4 = vcmp.ne.s32.totalorder %v1728_v14, 0  ;;  %vm2993_vm6 = vnez %v2951_v29  ;;  %v3000_v14 = vmov 0  ;;  %v3005_v29 = vmov 0 }
 0x10d   : > { %v2989_v31 = vsel %vm2086_vm0, 4294967295, %v2988_v31  ;;  %vm2095_vm8 = vmand %vm1997_vm3, %vm406_vm14  ;;  %vm490_vm14 = vcmp.ne.s32.totalorder %v1776_v33, 0  ;;  %v3009_v33 = vmov 0 }
 0x10e   : > { %v2991_v28 = vsel %vm2095_vm8, 4294967295, %v2990_v28  ;;  %vm2108_vm0 = vmand %vm2993_vm6, %vm2992_vm4  ;;  %vm3002_vm6 = vcmp.ge.s32.totalorder %v1530_v47, 0  ;;  %925 = vrot.lane.b32.xlu1 %v1386_v62, %s1261_s28  ;;  %923 = vrot.lane.b32.xlu0 %v1382_v60, %s1261_s28  ;;  %vm492_vm4 = vcmp.ne.s32.totalorder %v1784_v43, 0  ;;  %v3019_v43 = vmov 0 }
 0x10f   : > { %v2995_v25 = vsel %vm2108_vm0, 4294967295, %v2994_v25  ;;  %vm2116_vm3 = vmand %vm2010_vm1, %vm2996_vm13  ;;  %vm489_vm13 = vcmp.ne.s32.totalorder %v1778_v34, 0  ;;  %v3012_v34 = vmov 0 }
 0x110   : > { %vm2123_vm8 = vmand %vm2999_vm5, %vm397_vm15  ;;  %vm399_vm15 = vcmp.ne.s32.totalorder %v1738_v20, 0  ;;  %vm3008_vm5 = vcmp.ge.s32.totalorder %v1532_v48, 0  ;;  %v3015_v20 = vmov 0  ;;  %v2171_v30 = vpop.permute.xlu1 %637 }
 0x111   : > { %v3001_v14 = vsel %vm2123_vm8, 4294967295, %v3000_v14  ;;  %vm2130_vm0 = vmand %vm3002_vm6, %vm324_vm9  ;;  %vm3007_vm9 = vcmp.lt.s32.totalorder %v1532_v48, 16 }
 0x112   : > { %v3004_v12 = vsel %vm2130_vm0, 4294967295, %v3003_v12  ;;  %vm2136_vm1 = vmand %vm2054_vm7, %vm488_vm11  ;;  %vm3011_vm11 = vcmp.ne.s32.totalorder %v1770_v26, 0  ;;  %vm3014_vm0 = vnez %v2973_v39  ;;  %v2173_v26 = vpop.permute.xlu0 %635  ;;  %929 = vrot.lane.b32.xlu1 %v1392_v2, %s1261_s28  ;;  %927 = vrot.lane.b32.xlu0 %v1394_v3, %s1261_s28  ;;  %v3153_v39 = vld [vmem:[#allocation3_spill] sm:$0xff] }
 0x113   : > { %v3006_v29 = vsel %vm2136_vm1, 4294967295, %v3005_v29  ;;  %vm2150_vm6 = vmand %vm3008_vm5, %vm3007_vm9  ;;  %vm491_vm9 = vcmp.ne.s32.totalorder %v1786_v44, 0  ;;  %vm501_vm5 = vcmp.ne.s32.totalorder %v1838_v38, 0  ;;  %v3025_v44 = vmov 0 }
 0x114   : > { %v3010_v33 = vsel %vm2150_vm6, 4294967295, %v3009_v33  ;;  %vm2158_vm7 = vmand %vm2020_vm10, %vm3011_vm11  ;;  %vm3017_vm10 = vcmp.ne.s32.totalorder %v1736_v19, 0  ;;  %vm3018_vm11 = vnez %v2960_v1  ;;  %v3027_v19 = vmov 0 }
 0x115   : > { %v3013_v34 = vsel %vm2158_vm7, 4294967295, %v3012_v34  ;;  %vm2165_vm8 = vmand %vm3014_vm0, %vm490_vm14  ;;  %vm3021_vm0 = vnez %v2970_v52  ;;  %v3029_v52 = vmov 0  ;;  %vm551_vm1 = vcmp.ne.s32.totalorder %v1848_v0, 0 }
 0x116   : > { %v3016_v20 = vsel %vm2165_vm8, 4294967295, %v3015_v20  ;;  %vm2179_vm6 = vmand %vm3018_vm11, %vm3017_vm10  ;;  %vm3024_vm8 = vnez %v2968_v23  ;;  %vm3032_vm11 = vnez %v2991_v28  ;;  %v3039_v38 = vmov 0  ;;  %933 = vrot.lane.b32.xlu1 %v1396_v4, %s1261_s28  ;;  %931 = vrot.lane.b32.xlu0 %v1398_v5, %s1261_s28 }
 0x117   : > { %v3020_v43 = vsel %vm2179_vm6, 4294967295, %v3019_v43  ;;  %vm2185_vm14 = vmand %vm3021_vm0, %vm489_vm13  ;;  %vm552_vm13 = vcmp.ne.s32.totalorder %v1846_v57, 0  ;;  %v3048_v0 = vmov 0  ;;  %v3055_v1 = vmov 0 }
 0x118   : > { %vm2192_vm7 = vmand %vm3024_vm8, %vm399_vm15  ;;  %vm401_vm8 = vcmp.ne.s32.totalorder %v1746_v16, 0  ;;  %v3131_v16 = vld [vmem:[#allocation19_spill] sm:$0xff]  ;;  %v3139_v57 = vmov 0 }
 0x119   : > { %v3026_v44 = vsel %vm2192_vm7, 4294967295, %v3025_v44  ;;  %vm2199_vm10 = vmand %vm2061_vm2, %vm492_vm4  ;;  %vm494_vm2 = vcmp.ne.s32.totalorder %v1796_v53, 0  ;;  %vm3031_vm4 = vcmp.ne.s32.totalorder %v1836_v37, 0  ;;  %v2233_v53 = vpop.permute.xlu1 %641  ;;  %v2235_v37 = vpop.permute.xlu0 %639  ;;  %vm3044_vm7 = vnez %v2989_v31 }
 0x11a   : > { %v3028_v19 = vsel %vm2199_vm10, 4294967295, %v3027_v19  ;;  %vm2211_vm15 = vmand %vm2079_vm12, %vm491_vm9  ;;  %vm3041_vm10 = vnez %v3006_v29  ;;  %vm3058_vm9 = vnez %v3016_v20  ;;  %937 = vrot.lane.b32.xlu1 %v1504_v35, %s1261_s28  ;;  %935 = vrot.lane.b32.xlu0 %v1506_v36, %s1261_s28  ;;  %v3111_v29 = vld [vmem:[#allocation6_spill] sm:$0xff]  ;;  %v3118_v20 = vld [vmem:[#allocation7_spill] sm:$0xff] }
 0x11b   : > { %v3030_v52 = vsel %vm2211_vm15, 4294967295, %v3029_v52  ;;  %vm2220_vm0 = vmand %vm3032_vm11, %vm3031_vm4  ;;  %vm3037_vm4 = vcmp.ne.s32.totalorder %v1744_v15, 0  ;;  %vm3038_vm11 = vnez %v2983_v59  ;;  %v3045_v15 = vmov 0 }
 0x11c   : > { %vm2228_vm12 = vmand %vm2116_vm3, %vm501_vm5  ;;  %vm553_vm5 = vcmp.ne.s32.totalorder %v1858_v55, 0  ;;  %v3089_v59 = vmov 0  ;;  %v3146_v55 = vld [vmem:[#allocation12_spill] sm:$0xff] }
 0x11d   : > { %vm2241_vm15 = vmand %vm3038_vm11, %vm3037_vm4  ;;  %vm3047_vm11 = vnez %v2995_v25  ;;  %v644_v58 = vpop.permute.xlu0 %643  ;;  %v3098_v25 = vld [vmem:[#allocation9_spill] sm:$0xff] }
 0x11e   : > { %v3040_v38 = vsel %vm2241_vm15, 4294967295, %v3039_v38  ;;  %vm2247_vm3 = vmand %vm3041_vm10, %vm552_vm13  ;;  %vm3050_vm10 = vnez %v3013_v34  ;;  %941 = vrot.lane.b32.xlu1 %v1510_v41, %s1261_s28  ;;  %939 = vrot.lane.b32.xlu0 %v1512_v42, %s1261_s28  ;;  %v3116_v34 = vmov 0 }
 0x11f   : > { %vm2255_vm6 = vmand %vm3044_vm7, %vm401_vm8  ;;  %vm3053_vm8 = vcmp.ne.s32.totalorder %v1798_v54, 0  ;;  %v3061_v54 = vmov 0 }
 0x120   : > { %v3046_v15 = vsel %vm2255_vm6, 4294967295, %v3045_v15  ;;  %vm2262_vm15 = vmand %vm3047_vm11, %vm494_vm2  ;;  %vm3054_vm2 = vnez %v3001_v14  ;;  %v3105_v14 = vmov 0 }
 0x121   : > { %v3049_v0 = vsel %vm2262_vm15, 4294967295, %v3048_v0  ;;  %vm2268_vm13 = vmand %vm3050_vm10, %vm551_vm1  ;;  %vm3057_vm10 = vcmp.ne.s32.totalorder %v1856_v50, 0  ;;  %v646_v50 = vpop.permute.xlu1 %645  ;;  %v680_v28 = vpop.permute.xlu0 %679 }
 0x122   : > { %vm2282_vm11 = vmand %vm3054_vm2, %vm3053_vm8  ;;  %vm3063_vm2 = vcmp.ne.s32.totalorder %v1904_v56, 0  ;;  %vm662_vm8 = vcmp.ne.s32.totalorder %v646_v50, 0  ;;  %v3075_v56 = vmov 0  ;;  %945 = vrot.lane.b32.xlu1 %v1530_v47, %s1261_s28  ;;  %943 = vrot.lane.b32.xlu0 %v1532_v48, %s1261_s28  ;;  %v3150_v50 = vmov 0 }
 0x123   : > { %v3056_v1 = vsel %vm2282_vm11, 4294967295, %v3055_v1  ;;  %vm2291_vm4 = vmand %vm3058_vm9, %vm3057_vm10  ;;  %vm3064_vm9 = vcmp.ne.s32.totalorder %v1752_v9, 0  ;;  %vm3065_vm10 = vnez %v3004_v12  ;;  %vm3070_vm11 = vnez %v3010_v33 }
 0x124   : > { %v3060_v40 = vsel %vm2291_vm4, 4294967295, %v3059_v40  ;;  %vm2298_vm15 = vmand %vm2185_vm14, %vm553_vm5  ;;  %vm3069_vm4 = vcmp.ne.s32.totalorder %v1754_v13, 0  ;;  %v3082_v13 = vmov 0  ;;  %v3109_v12 = vmov 0 }
 0x125   : > { %v3062_v54 = vsel %vm2298_vm15, 4294967295, %v3061_v54  ;;  %vm582_vm1 = vmand %vm2220_vm0, %vm3063_vm2  ;;  %vm3068_vm15 = vcmp.ne.s32.totalorder %v1906_v22, 0  ;;  %vm661_vm2 = vcmp.ne.s32.totalorder %v644_v58, 0  ;;  %v3077_v22 = vld [vmem:[#allocation16_spill] sm:$0xff]  ;;  %v682_v31 = vpop.permute.xlu1 %681  ;;  %v3114_v33 = vmov 0  ;;  %v3152_v58 = vld [vmem:[#allocation2_spill] sm:$0xff] }
 0x126   : > { %vm2311_vm7 = vmand %vm3065_vm10, %vm3064_vm9  ;;  %vm3073_vm9 = vcmp.ne.s32.totalorder %v1806_v17, 0  ;;  %vm3074_vm10 = vnez %v3020_v43  ;;  %v3084_v17 = vld [vmem:[#allocation4_spill] sm:$0xff]  ;;  %v3121_v43 = vmov 0  ;;  %949 = vrot.lane.b32.xlu1 %v3152_v58, %s1261_s28  ;;  %947 = vrot.lane.b32.xlu0 %v3153_v39, %s1261_s28  ;;  %v3156_v9 = vmov 0 }
 0x127   : > { %vm581_vm0 = vmand %vm2228_vm12, %vm3068_vm15  ;;  %vm3080_vm12 = vcmp.ne.s32.totalorder %v1808_v21, 0  ;;  %v3091_v21 = vld [vmem:[#allocation5_spill] sm:$0xff] }
 0x128   : > { %vm2325_vm6 = vmand %vm3070_vm11, %vm3069_vm4  ;;  %vm3081_vm4 = vnez %v3026_v44 }
 0x129   : > { %vm2333_vm5 = vmand %vm3074_vm10, %vm3073_vm9  ;;  %vm498_vm9 = vcmp.ne.s32.totalorder %v3084_v17, 0  ;;  %v686_v44 = vpop.permute.xlu1 %685  ;;  %v3163_v17 = vld [vmem:[#allocation15_spill] sm:$0xff] }
 0x12a   : > { %v3076_v56 = vsel %vm2333_vm5, 4294967295, %v3075_v56  ;;  %vm2338_vm15 = vmand %vm582_vm1, %vm662_vm8  ;;  %vm3085_vm1 = vcmp.ne.s32.totalorder %v1866_v7, 0  ;;  %vm3086_vm8 = vnez %v3028_v19  ;;  %v3096_v7 = vld [vmem:[#allocation8_spill] sm:$0xff]  ;;  %vm3101_vm5 = vnez %v3040_v38  ;;  %v684_v19 = vpop.permute.xlu0 %683  ;;  %985 = vrot.lane.b32.xlu1 %v1388_v63, %s1262_s29  ;;  %983 = vrot.lane.b32.xlu0 %v1384_v61, %s1262_s29 }
 0x12b   : > { %v3079_v46 = vsel %vm2338_vm15, 4294967295, %v3078_v46  ;;  %vm2350_vm11 = vmand %vm3081_vm4, %vm3080_vm12  ;;  %vm3092_vm12 = vcmp.ne.s32.totalorder %v1868_v27, 0  ;;  %vm3093_vm4 = vnez %v3030_v52  ;;  %vm712_vm15 = vcmp.ne.s32.totalorder %v682_v31, 0  ;;  %v3126_v52 = vld [vmem:[#allocation11_spill] sm:$0xff] }
 0x12c   : > { %v3083_v13 = vsel %vm2350_vm11, 4294967295, %v3082_v13  ;;  %vm2359_vm10 = vmand %vm3086_vm8, %vm3085_vm1  ;;  %vm3097_vm1 = vcmp.ne.s32.totalorder %v1915_v49, 0  ;;  %v3104_v49 = vld [vmem:[#allocation18_spill] sm:$0xff]  ;;  %v3132_v38 = vmov 0  ;;  %v3175_v31 = vmov 0 }
 0x12d   : > { %vm2363_vm14 = vmand %vm581_vm0, %vm661_vm2  ;;  %vm652_vm2 = vcmp.ne.s32.totalorder %v1989_v24, 0 }
 0x12e   : > { %v3090_v59 = vsel %vm2363_vm14, 4294967295, %v3089_v59  ;;  %vm2372_vm11 = vmand %vm3093_vm4, %vm3092_vm12  ;;  %vm3100_vm14 = vcmp.ne.s32.totalorder %v3077_v22, 0  ;;  %vm711_vm4 = vcmp.ne.s32.totalorder %v680_v28, 0  ;;  %989 = vrot.lane.b32.xlu1 %v1386_v62, %s1262_s29  ;;  %987 = vrot.lane.b32.xlu0 %v1382_v60, %s1262_s29 }
 0x12f   : > { %v3095_v8 = vsel %vm2372_vm11, 4294967295, %v3094_v8  ;;  %vm664_vm0 = vmand %vm2247_vm3, %vm3097_vm1 }
 0x130   : > { %vm663_vm12 = vmand %vm2268_vm13, %vm3100_vm14  ;;  %vm3107_vm13 = vcmp.ne.s32.totalorder %v3091_v21, 0  ;;  %vm3108_vm14 = vnez %v3046_v15  ;;  %v3141_v15 = vmov 0  ;;  %v3169_v21 = vmov 0 }
 0x131   : > { %vm2389_vm11 = vmand %vm3101_vm5, %vm498_vm9  ;;  %vm500_vm9 = vcmp.ne.s32.totalorder %v3111_v29, 0 }
 0x132   : > { %vm2394_vm1 = vmand %vm664_vm0, %vm712_vm15  ;;  %vm3112_vm15 = vcmp.ne.s32.totalorder %v3096_v7, 0  ;;  %vm3113_vm0 = vnez %v3049_v0  ;;  %v3144_v0 = vmov 0  ;;  %993 = vrot.lane.b32.xlu1 %v1392_v2, %s1262_s29  ;;  %991 = vrot.lane.b32.xlu0 %v1394_v3, %s1262_s29 }
 0x133   : > { %v3106_v14 = vsel %vm2394_vm1, 4294967295, %v3105_v14  ;;  %vm2406_vm5 = vmand %vm3108_vm14, %vm3107_vm13  ;;  %vm3119_vm13 = vcmp.ne.s32.totalorder %v3098_v25, 0  ;;  %vm3120_vm14 = vnez %v3056_v1  ;;  %v690_v1 = vpop.permute.xlu1 %689 }
 0x134   : > { %v3110_v12 = vsel %vm2406_vm5, 4294967295, %v3109_v12  ;;  %vm2415_vm3 = vmand %vm3113_vm0, %vm3112_vm15  ;;  %vm3124_vm15 = vcmp.ne.s32.totalorder %v3099_v32, 0  ;;  %vm3125_vm0 = vnez %v3060_v40  ;;  %v688_v40 = vpop.permute.xlu0 %687 }
 0x135   : > { %v3115_v33 = vsel %vm2415_vm3, 4294967295, %v3114_v33  ;;  %vm2419_vm8 = vmand %vm663_vm12, %vm711_vm4  ;;  %vm559_vm4 = vcmp.ne.s32.totalorder %v3126_v52, 0  ;;  %vm3127_vm3 = vcmp.ne.s32.totalorder %v3104_v49, 0 }
 0x136   : > { %v3117_v34 = vsel %vm2419_vm8, 4294967295, %v3116_v34  ;;  %vm2428_vm1 = vmand %vm3120_vm14, %vm3119_vm13  ;;  %vm714_vm8 = vcmp.ne.s32.totalorder %v686_v44, 0  ;;  %vm3128_vm13 = vnez %v3062_v54  ;;  %v3147_v54 = vld [vmem:[#allocation13_spill] sm:$0xff]  ;;  %997 = vrot.lane.b32.xlu1 %v1396_v4, %s1262_s29  ;;  %995 = vrot.lane.b32.xlu0 %v1398_v5, %s1262_s29 }
 0x137   : > { %v3122_v43 = vsel %vm2428_vm1, 4294967295, %v3121_v43  ;;  %vm666_vm12 = vmand %vm3125_vm0, %vm3124_vm15  ;;  %vm713_vm1 = vcmp.ne.s32.totalorder %v684_v19, 0  ;;  %vm3143_vm15 = vnez %v3083_v13  ;;  %v694_v22 = vpop.permute.xlu1 %693 }
 0x138   : > { %vm665_vm14 = vmand %vm3128_vm13, %vm3127_vm3  ;;  %vm3134_vm3 = vcmp.ne.s32.totalorder %v3118_v20, 0  ;;  %v692_v13 = vpop.permute.xlu0 %691  ;;  %v3192_v20 = vmov 0 }
 0x139   : > { %vm2445_vm5 = vmand %vm2311_vm7, %vm500_vm9  ;;  %vm3137_vm9 = vcmp.ne.s32.totalorder %v3123_v45, 0 }
 0x13a   : > { %vm2450_vm0 = vmand %vm666_vm12, %vm714_vm8  ;;  %vm3138_vm8 = vnez %v3076_v56  ;;  %v3161_v56 = vld [vmem:[#allocation14_spill] sm:$0xff]  ;;  %1001 = vrot.lane.b32.xlu1 %v1504_v35, %s1262_s29  ;;  %999 = vrot.lane.b32.xlu0 %v1506_v36, %s1262_s29 }
 0x13b   : > { %v3133_v38 = vsel %vm2450_vm0, 4294967295, %v3132_v38  ;;  %vm2462_vm7 = vmand %vm2325_vm6, %vm3134_vm3  ;;  %vm562_vm6 = vcmp.ne.s32.totalorder %v3146_v55, 0 }
 0x13c   : > { %vm2470_vm12 = vmand %vm3138_vm8, %vm3137_vm9  ;;  %vm561_vm9 = vcmp.ne.s32.totalorder %v3147_v54, 0  ;;  %vm3148_vm8 = vcmp.ne.s32.totalorder %v3131_v16, 0  ;;  %v696_v7 = vpop.permute.xlu0 %695  ;;  %v3207_v16 = vmov 0  ;;  %v3225_v54 = vmov 0 }
 0x13d   : > { %v3140_v57 = vsel %vm2470_vm12, 4294967295, %v3139_v57  ;;  %vm2474_vm13 = vmand %vm665_vm14, %vm713_vm1  ;;  %vm654_vm1 = vcmp.ne.s32.totalorder %v2046_v10, 0  ;;  %vm716_vm14 = vcmp.ne.s32.totalorder %v690_v1, 0  ;;  %v3154_v10 = vmov 0 }
 0x13e   : > { %v3142_v15 = vsel %vm2474_vm13, 4294967295, %v3141_v15  ;;  %vm2480_vm0 = vmand %vm3143_vm15, %vm559_vm4  ;;  %vm3149_vm13 = vnez %v3095_v8  ;;  %vm715_vm15 = vcmp.ne.s32.totalorder %v688_v40, 0  ;;  %v698_v8 = vpop.permute.xlu1 %697  ;;  %1005 = vrot.lane.b32.xlu1 %v1510_v41, %s1262_s29  ;;  %1003 = vrot.lane.b32.xlu0 %v1512_v42, %s1262_s29  ;;  %v3222_v40 = vmov 0 }
 0x13f   : > { %v3145_v0 = vsel %vm2480_vm0, 4294967295, %v3144_v0  ;;  %vm668_vm3 = vmand %vm2359_vm10, %vm652_vm2  ;;  %vm653_vm0 = vcmp.ne.s32.totalorder %v2048_v51, 0  ;;  %v3231_v51 = vmov 0 }
 0x140   : > { %vm667_vm4 = vmand %vm3149_vm13, %vm3148_vm8  ;;  %vm3158_vm13 = vnez %v3110_v12  ;;  %vm3162_vm8 = vnez %v3115_v33  ;;  %v700_v25 = vpop.permute.xlu0 %699 }
 0x141   : > { %vm2494_vm12 = vmand %vm668_vm3, %vm716_vm14  ;;  %vm564_vm14 = vcmp.ne.s32.totalorder %v3161_v56, 0 }
 0x142   : > { %v3151_v50 = vsel %vm2494_vm12, 4294967295, %v3150_v50  ;;  %vm2504_vm10 = vmand %vm2389_vm11, %vm562_vm6  ;;  %vm563_vm11 = vcmp.ne.s32.totalorder %v3163_v17, 0  ;;  %vm656_vm6 = vcmp.ne.s32.totalorder %v2100_v18, 0  ;;  %1009 = vrot.lane.b32.xlu1 %v1530_v47, %s1262_s29  ;;  %1007 = vrot.lane.b32.xlu0 %v1532_v48, %s1262_s29  ;;  %v3237_v17 = vmov 0 }
 0x143   : > { %v3155_v10 = vsel %vm2504_vm10, 4294967295, %v3154_v10  ;;  %vm2508_vm2 = vmand %vm667_vm4, %vm715_vm15  ;;  %vm718_vm4 = vcmp.ne.s32.totalorder %v694_v22, 0  ;;  %vm3164_vm15 = vnez %v3122_v43  ;;  %vm717_vm10 = vcmp.ne.s32.totalorder %v692_v13, 0 }
 0x144   : > { %v3157_v9 = vsel %vm2508_vm2, 4294967295, %v3156_v9  ;;  %vm2514_vm3 = vmand %vm3158_vm13, %vm561_vm9  ;;  %vm655_vm9 = vcmp.ne.s32.totalorder %v2102_v6, 0  ;;  %v704_v27 = vpop.permute.xlu0 %703  ;;  %v3234_v13 = vmov 0  ;;  %v3244_v6 = vmov 0 }
 0x145   : > { %vm670_vm12 = vmand %vm3162_vm8, %vm654_vm1  ;;  %vm3173_vm8 = vnez %v3140_v57 }
 0x146   : > { %vm669_vm2 = vmand %vm3164_vm15, %vm653_vm0  ;;  %vm3174_vm15 = vnez %v3145_v0  ;;  %1013 = vrot.lane.b32.xlu1 %v3152_v58, %s1262_s29  ;;  %1011 = vrot.lane.b32.xlu0 %v3153_v39, %s1262_s29  ;;  %v3218_v0 = vmov 0 }
 0x147   : > { %vm2526_vm13 = vmand %vm670_vm12, %vm718_vm4 }
 0x148   : > { %v3166_v11 = vsel %vm2526_vm13, 4294967295, %v3165_v11  ;;  %vm2536_vm1 = vmand %vm2445_vm5, %vm564_vm14  ;;  %vm658_vm5 = vcmp.ne.s32.totalorder %v2171_v30, 0  ;;  %vm720_vm14 = vcmp.ne.s32.totalorder %v698_v8, 0  ;;  %v702_v30 = vpop.permute.xlu1 %701  ;;  %v708_v29 = vpop.permute.xlu0 %707 }
 0x149   : > { %vm2540_vm0 = vmand %vm669_vm2, %vm717_vm10  ;;  %vm719_vm2 = vcmp.ne.s32.totalorder %v696_v7, 0 }
 0x14a   : > { %v3170_v21 = vsel %vm2540_vm0, 4294967295, %v3169_v21  ;;  %vm2546_vm12 = vmand %vm2462_vm7, %vm563_vm11  ;;  %vm657_vm0 = vcmp.ne.s32.totalorder %v2173_v26, 0  ;;  %vm3179_vm11 = vnez %v3155_v10 }
 0x14b   : > { %vm672_vm4 = vmand %vm3173_vm8, %vm656_vm6  ;;  %vm722_vm8 = vcmp.ne.s32.totalorder %v702_v30, 0 }
 0x14c   : > { %vm671_vm10 = vmand %vm3174_vm15, %vm655_vm9  ;;  %vm660_vm9 = vcmp.ne.s32.totalorder %v2233_v53, 0  ;;  %vm659_vm15 = vcmp.ne.s32.totalorder %v2235_v37, 0  ;;  %v706_v53 = vpop.permute.xlu1 %705  ;;  %v776_v45 = vpop.permute.xlu0 %775 }
 0x14d   : > { %vm2556_vm13 = vmand %vm672_vm4, %vm720_vm14  ;;  %vm721_vm14 = vcmp.ne.s32.totalorder %v700_v25, 0 }
 0x14e   : > { %v3176_v31 = vsel %vm2556_vm13, 4294967295, %v3175_v31  ;;  %vm2564_vm7 = vmand %vm671_vm10, %vm719_vm2  ;;  %vm723_vm2 = vcmp.ne.s32.totalorder %v704_v27, 0 }
 0x14f   : > { %vm674_vm6 = vmand %vm3179_vm11, %vm658_vm5 }
 0x150   : > { %vm673_vm4 = vmand %vm2514_vm3, %vm657_vm0  ;;  %vm724_vm0 = vcmp.ne.s32.totalorder %v706_v53, 0  ;;  %v710_v12 = vpop.permute.xlu1 %709  ;;  %v780_v19 = vpop.permute.xlu0 %779 }
 0x151   : > { %vm2574_vm13 = vmand %vm674_vm6, %vm722_vm8 }
 0x152   : > { %vm2582_vm5 = vmand %vm673_vm4, %vm721_vm14  ;;  %vm3191_vm4 = vnez %v3090_v59  ;;  %v3198_v59 = vmov 0 }
 0x153   : > { %vm676_vm3 = vmand %vm2536_vm1, %vm660_vm9  ;;  %vm726_vm1 = vcmp.ne.s32.totalorder %v710_v12, 0  ;;  %vm725_vm9 = vcmp.ne.s32.totalorder %v708_v29, 0 }
 0x154   : > { %vm675_vm10 = vmand %vm2546_vm12, %vm659_vm15  ;;  %vm3188_vm12 = vnez %v3079_v46  ;;  %v778_v43 = vpop.permute.xlu1 %777  ;;  %v3195_v46 = vmov 0  ;;  %v784_v23 = vpop.permute.xlu0 %783 }
 0x155   : > { %vm2590_vm11 = vmand %vm676_vm3, %vm724_vm0  ;;  %vm808_vm15 = vcmp.ne.s32.totalorder %v778_v43, 0  ;;  %vm807_vm3 = vcmp.ne.s32.totalorder %v776_v45, 0  ;;  %vm3194_vm0 = vnez %v3106_v14  ;;  %v3201_v14 = vmov 0 }
 0x156   : > { %vm2598_vm6 = vmand %vm675_vm10, %vm723_vm2  ;;  %vm3197_vm2 = vnez %v3117_v34  ;;  %v3204_v34 = vmov 0 }
 0x157   : > { %vm2604_vm8 = vmand %vm3188_vm12, %vm726_vm1  ;;  %vm809_vm12 = vcmp.ne.s32.totalorder %v780_v19, 0 }
 0x158   : > { %vm2614_vm14 = vmand %vm3191_vm4, %vm725_vm9  ;;  %v782_v44 = vpop.permute.xlu1 %781  ;;  %vm3200_vm4 = vnez %v3133_v38  ;;  %v3210_v38 = vmov 0  ;;  %v788_v57 = vpop.permute.xlu0 %787 }
 0x159   : > { %v3193_v20 = vsel %vm2614_vm14, 4294967295, %v3192_v20  ;;  %vm2624_vm10 = vmand %vm3194_vm0, %vm808_vm15  ;;  %vm810_vm9 = vcmp.ne.s32.totalorder %v782_v44, 0 }
 0x15a   : > { %v3196_v46 = vsel %vm2624_vm10, 4294967295, %v3195_v46  ;;  %vm2630_vm1 = vmand %vm3197_vm2, %vm807_vm3  ;;  %vm3203_vm3 = vnez %v3142_v15  ;;  %vm3213_vm10 = vnez %v3166_v11  ;;  %v3214_v15 = vmov 0 }
 0x15b   : > { %v3199_v59 = vsel %vm2630_vm1, 4294967295, %v3198_v59  ;;  %vm2640_vm15 = vmand %vm3200_vm4, %vm810_vm9  ;;  %vm811_vm1 = vcmp.ne.s32.totalorder %v784_v23, 0  ;;  %vm3206_vm9 = vnez %v3151_v50 }
 0x15c   : > { %v3202_v14 = vsel %vm2640_vm15, 4294967295, %v3201_v14  ;;  %vm2646_vm0 = vmand %vm3203_vm3, %vm809_vm12  ;;  %v786_v52 = vpop.permute.xlu1 %785  ;;  %vm3209_vm12 = vnez %v3157_v9  ;;  %vm813_vm15 = vcmp.ne.s32.totalorder %v788_v57, 0  ;;  %v792_v1 = vpop.permute.xlu0 %791  ;;  %v3228_v9 = vmov 0 }
 0x15d   : > { %v3205_v34 = vsel %vm2646_vm0, 4294967295, %v3204_v34  ;;  %vm812_vm2 = vcmp.ne.s32.totalorder %v786_v52, 0  ;;  %vm2662_vm3 = vmand %vm3209_vm12, %vm811_vm1  ;;  %vm815_vm12 = vcmp.ne.s32.totalorder %v792_v1, 0 }
 0x15e   : > { %vm2656_vm4 = vmand %vm3206_vm9, %vm812_vm2  ;;  %v3211_v38 = vsel %vm2662_vm3, 4294967295, %v3210_v38  ;;  %vm3217_vm2 = vnez %v3170_v21  ;;  %vm3221_vm3 = vnez %v3176_v31  ;;  %v3240_v21 = vmov 0 }
 0x15f   : > { %v3208_v16 = vsel %vm2656_vm4, 4294967295, %v3207_v16  ;;  %3212 = vst [vmem:[#allocation16_spill] sm:$0xff] %v3211_v38  ;;  %vm2674_vm9 = vmand %vm3217_vm2, %vm813_vm15  ;;  %v848_v38 = vmul.u32 4, %v1504_v35 }
 0x160   : > { %v790_v24 = vpop.permute.xlu1 %789  ;;  %v3219_v0 = vsel %vm2674_vm9, 4294967295, %v3218_v0  ;;  %v796_v10 = vpop.permute.xlu0 %795 }
 0x161   : > { %vm814_vm0 = vcmp.ne.s32.totalorder %v790_v24, 0  ;;  %3220 = vst [vmem:[#allocation5_spill] sm:$0xff] %v3219_v0 }
 0x162   : > { %vm2668_vm14 = vmand %vm3213_vm10, %vm814_vm0  ;;  %vm817_vm0 = vcmp.ne.s32.totalorder %v796_v10, 0  ;;  %v839_v10 = vmul.u32 4, %v1384_v61 }
 0x163   : > { %v3215_v15 = vsel %vm2668_vm14, 4294967295, %v3214_v15  ;;  %vm2686_vm10 = vmand %vm2564_vm7, %vm815_vm12 }
 0x164   : > { %3216 = vst [vmem:[#allocation4_spill] sm:$0xff] %v3215_v15  ;;  %v794_v55 = vpop.permute.xlu1 %793  ;;  %v3226_v54 = vsel %vm2686_vm10, 4294967295, %v3225_v54  ;;  %v800_v22 = vpop.permute.xlu0 %799 }
 0x165   : > { %vm816_vm1 = vcmp.ne.s32.totalorder %v794_v55, 0  ;;  %3227 = vst [vmem:[#allocation9_spill] sm:$0xff] %v3226_v54 }
 0x166   : > { %vm2680_vm4 = vmand %vm3221_vm3, %vm816_vm1  ;;  %vm819_vm1 = vcmp.ne.s32.totalorder %v800_v22, 0 }
 0x167   : > { %v3223_v40 = vsel %vm2680_vm4, 4294967295, %v3222_v40  ;;  %vm2698_vm3 = vmand %vm2582_vm5, %vm817_vm0 }
 0x168   : > { %3224 = vst [vmem:[#allocation8_spill] sm:$0xff] %v3223_v40  ;;  %v798_v50 = vpop.permute.xlu1 %797  ;;  %v3232_v51 = vsel %vm2698_vm3, 4294967295, %v3231_v51  ;;  %v804_v18 = vpop.permute.xlu0 %803 }
 0x169   : > { %vm818_vm15 = vcmp.ne.s32.totalorder %v798_v50, 0  ;;  %3233 = vst [vmem:[#allocation18_spill] sm:$0xff] %v3232_v51  ;;  %v840_v50 = vmul.u32 4, %v1388_v63 }
 0x16a   : > { %vm2692_vm2 = vmand %vm2574_vm13, %vm818_vm15  ;;  %vm821_vm15 = vcmp.ne.s32.totalorder %v804_v18, 0 }
 0x16b   : > { %v3229_v9 = vsel %vm2692_vm2, 4294967295, %v3228_v9  ;;  %vm2710_vm13 = vmand %vm2598_vm6, %vm819_vm1  ;;  %vm1079_vm6 = vcmask 7168   ;;  %vm3248_vm1 = vnez %v3199_v59 }
 0x16c   : > { %3230 = vst [vmem:[#allocation17_spill] sm:$0xff] %v3229_v9  ;;  %v802_v56 = vpop.permute.xlu1 %801  ;;  %v3238_v17 = vsel %vm2710_vm13, 4294967295, %v3237_v17  ;;  %v856_v7 = vpop.permute.xlu0 %855 }
 0x16d   : > { %vm820_vm7 = vcmp.ne.s32.totalorder %v802_v56, 0  ;;  %3239 = vst [vmem:[#allocation7_spill] sm:$0xff] %v3238_v17  ;;  %v887_v18 = vadd.s32 %v856_v7, %v839_v10  ;;  %v844_v17 = vmul.u32 4, %v1392_v2 }
 0x16e   : > { %vm2704_vm12 = vmand %vm2590_vm11, %vm820_vm7  ;;  %vm3243_vm11 = vnez %v3193_v20 }
 0x16f   : > { %v3235_v13 = vsel %vm2704_vm12, 4294967295, %v3234_v13  ;;  %vm2722_vm7 = vmand %vm3243_vm11, %vm821_vm15  ;;  %v903_v61 = vmul.u32 8, %v887_v18  ;;  %vm3250_vm15 = vnez %v3205_v34  ;;  %vm3251_vm11 = vnez %v3208_v16 }
 0x170   : > { %3236 = vst [vmem:[#allocation6_spill] sm:$0xff] %v3235_v13  ;;  %v806_v11 = vpop.permute.xlu1 %805  ;;  %v3245_v6 = vsel %vm2722_vm7, 4294967295, %v3244_v6  ;;  %v860_v28 = vpop.permute.xlu0 %859  ;;  %v843_v13 = vmul.u32 4, %v1394_v3 }
 0x171   : > { %vm822_vm5 = vcmp.ne.s32.totalorder %v806_v11, 0  ;;  %3246 = vst [vmem:[#allocation11_spill] sm:$0xff] %v3245_v6  ;;  %v842_v6 = vmul.u32 4, %v1386_v62  ;;  %v846_v62 = vmul.u32 4, %v1396_v4 }
 0x172   : > { %vm2716_vm0 = vmand %vm2604_vm8, %vm822_vm5  ;;  %vm3247_vm8 = vnez %v3196_v46  ;;  %vm3249_vm5 = vnez %v3202_v14 }
 0x173   : > { %v3241_v21 = vsel %vm2716_vm0, 4294967295, %v3240_v21 }
 0x174   : > { %3242 = vst [vmem:[#allocation10_spill] sm:$0xff] %v3241_v21  ;;  %v858_v8 = vpop.permute.xlu1 %857  ;;  %v864_v25 = vpop.permute.xlu0 %863  ;;  %v841_v21 = vmul.u32 4, %v1382_v60  ;;  %v845_v60 = vmul.u32 4, %v1398_v5 }
 0x175   : > { %v888_v11 = vadd.s32 %v858_v8, %v840_v50  ;;  %v891_v7 = vadd.s32 %v864_v25, %v843_v13 }
 0x176   : > { %v889_v40 = vadd.s32 %v860_v28, %v841_v21 }
 0x177   : > { %v904_v63 = vmul.u32 8, %v888_v11  ;;  %v847_v11 = vmul.u32 4, %v1506_v36 }
 0x178   : > { %v862_v31 = vpop.permute.xlu1 %861  ;;  %v868_v32 = vpop.permute.xlu0 %867  ;;  %v905_v10 = vmul.u32 8, %v889_v40  ;;  %v907_v13 = vmul.u32 8, %v891_v7 }
 0x179   : > { %v890_v54 = vadd.s32 %v862_v31, %v842_v6  ;;  %v893_v5 = vadd.s32 %v868_v32, %v845_v60 }
 0x17b   : > { %v906_v3 = vmul.u32 8, %v890_v54 }
 0x17c   : > { %v866_v30 = vpop.permute.xlu1 %865  ;;  %v2728_v27 = vpop.permute.xlu0 %871 }
 0x17d   : > { %v892_v8 = vadd.s32 %v866_v30, %v844_v17  ;;  %v895_v36 = vadd.s32 %v2728_v27, %v847_v11 }
 0x17f   : > { %v908_v17 = vmul.u32 8, %v892_v8 }
 0x180   : > { %v870_v26 = vpop.permute.xlu1 %869  ;;  %v2732_v49 = vpop.permute.xlu0 %875 }
 0x181   : > { %v894_v25 = vadd.s32 %v870_v26, %v846_v62 }
 0x184   : > { %v2726_v53 = vpop.permute.xlu1 %873  ;;  %v2736_v29 = vpop.permute.xlu0 %879 }
 0x185   : > { %v896_v35 = vadd.s32 %v2726_v53, %v848_v38 }
 0x188   : > { %v2730_v37 = vpop.permute.xlu1 %877  ;;  %v2740_v20 = vpop.permute.xlu0 %883 }
 0x18c   : > { %v2734_v12 = vpop.permute.xlu1 %881  ;;  %v920_v45 = vpop.permute.xlu0 %919 }
 0x18d   : > { %v951_v15 = vadd.s32 %v920_v45, %v903_v61 }
 0x18f   : > { %v967_v21 = vmul.u32 16, %v951_v15  ;;  %v850_v15 = vmul.u32 4, %v1510_v41 }
 0x190   : > { %v2738_v33 = vpop.permute.xlu1 %885  ;;  %v924_v19 = vpop.permute.xlu0 %923  ;;  %v912_v41 = vmul.u32 8, %v896_v35 }
 0x191   : > { %v953_v28 = vadd.s32 %v924_v19, %v905_v10  ;;  %v909_v19 = vmul.u32 8, %v893_v5 }
 0x194   : > { %v922_v43 = vpop.permute.xlu1 %921  ;;  %v928_v23 = vpop.permute.xlu0 %927 }
 0x195   : > { %v952_v0 = vadd.s32 %v922_v43, %v904_v63  ;;  %v969_v63 = vmul.u32 16, %v953_v28  ;;  %v955_v40 = vadd.s32 %v928_v23, %v907_v13  ;;  %v851_v23 = vmul.u32 4, %v1532_v48 }
 0x197   : > { %v968_v6 = vmul.u32 16, %v952_v0  ;;  %v849_v0 = vmul.u32 4, %v1512_v42 }
 0x198   : > { %v926_v44 = vpop.permute.xlu1 %925  ;;  %v2744_v57 = vpop.permute.xlu0 %931  ;;  %v971_v62 = vmul.u32 16, %v955_v40  ;;  %v911_v42 = vmul.u32 8, %v895_v36 }
 0x199   : > { %v954_v31 = vadd.s32 %v926_v44, %v906_v3  ;;  %v910_v44 = vmul.u32 8, %v894_v25  ;;  %v957_v53 = vadd.s32 %v2744_v57, %v909_v19  ;;  %v898_v3 = vadd.s32 %v2730_v37, %v850_v15 }
 0x19a   : > { %v854_v37 = vmul.u32 4, %v3152_v58 }
 0x19b   : > { %v970_v18 = vmul.u32 16, %v954_v31  ;;  %v899_v31 = vadd.s32 %v2736_v29, %v851_v23  ;;  %v914_v13 = vmul.u32 8, %v898_v3 }
 0x19c   : > { %v930_v52 = vpop.permute.xlu1 %929  ;;  %v2748_v1 = vpop.permute.xlu0 %935 }
 0x19d   : > { %v956_v54 = vadd.s32 %v930_v52, %v908_v17  ;;  %v852_v52 = vmul.u32 4, %v1530_v47  ;;  %v897_v47 = vadd.s32 %v2732_v49, %v849_v0  ;;  %v959_v57 = vadd.s32 %v2748_v1, %v911_v42 }
 0x19e   : > { %v853_v49 = vmul.u32 4, %v3153_v39  ;;  %v915_v58 = vmul.u32 8, %v899_v31 }
 0x19f   : > { %v972_v7 = vmul.u32 16, %v956_v54  ;;  %v975_v1 = vmul.u32 16, %v959_v57 }
 0x1a0   : > { %v2742_v24 = vpop.permute.xlu1 %933  ;;  %v2754_v22 = vpop.permute.xlu0 %939 }
 0x1a1   : > { %v958_v38 = vadd.s32 %v2742_v24, %v910_v44 }
 0x1a3   : > { %v974_v11 = vmul.u32 16, %v958_v38 }
 0x1a4   : > { %v2746_v55 = vpop.permute.xlu1 %937  ;;  %v2762_v9 = vpop.permute.xlu0 %943 }
 0x1a5   : > { %v960_v24 = vadd.s32 %v2746_v55, %v912_v41 }
 0x1a7   : > { %v976_v25 = vmul.u32 16, %v960_v24 }
 0x1a8   : > { %v2752_v56 = vpop.permute.xlu1 %941  ;;  %v2768_v2 = vpop.permute.xlu0 %947 }
 0x1a9   : > { %v962_v5 = vadd.s32 %v2752_v56, %v914_v13 }
 0x1ab   : > { %v978_v40 = vmul.u32 16, %v962_v5 }
 0x1ac   : > { %v2760_v51 = vpop.permute.xlu1 %945  ;;  %v984_v4 = vpop.permute.xlu0 %983 }
 0x1ad   : > { %v1015_v45 = vadd.s32 %v984_v4, %v967_v21  ;;  %v900_v21 = vadd.s32 %v2734_v12, %v852_v52 }
 0x1af   : > { %1031 = vrot.lane.b32.xlu0 %v1015_v45, %s1259_s26  ;;  %v916_v12 = vmul.u32 8, %v900_v21  ;;  %v902_v45 = vadd.s32 %v2738_v33, %v854_v37 }
 0x1b0   : > { %v2766_v50 = vpop.permute.xlu1 %949  ;;  %v988_v32 = vpop.permute.xlu0 %987 }
 0x1b1   : > { %v1017_v8 = vadd.s32 %v988_v32, %v969_v63  ;;  %v964_v56 = vadd.s32 %v2760_v51, %v916_v12  ;;  %v918_v0 = vmul.u32 8, %v902_v45 }
 0x1b3   : > { %1035 = vrot.lane.b32.xlu0 %v1017_v8, %s1259_s26  ;;  %v980_v44 = vmul.u32 16, %v964_v56  ;;  %v966_v19 = vadd.s32 %v2766_v50, %v918_v0 }
 0x1b4   : > { %v986_v30 = vpop.permute.xlu1 %985  ;;  %v992_v60 = vpop.permute.xlu0 %991 }
 0x1b5   : > { %v1016_v43 = vadd.s32 %v986_v30, %v968_v6  ;;  %v1019_v48 = vadd.s32 %v992_v60, %v971_v62  ;;  %v973_v6 = vmul.u32 16, %v957_v53  ;;  %v913_v30 = vmul.u32 8, %v897_v47 }
 0x1b6   : > { %v982_v23 = vmul.u32 16, %v966_v19 }
 0x1b7   : > { %1033 = vrot.lane.b32.xlu1 %v1016_v43, %s1259_s26  ;;  %1039 = vrot.lane.b32.xlu0 %v1019_v48, %s1259_s26  ;;  %v961_v43 = vadd.s32 %v2754_v22, %v913_v30  ;;  %v963_v22 = vadd.s32 %v2762_v9, %v915_v58 }
 0x1b8   : > { %v990_v26 = vpop.permute.xlu1 %989  ;;  %v996_v17 = vpop.permute.xlu0 %995 }
 0x1b9   : > { %v1018_v61 = vadd.s32 %v990_v26, %v970_v18  ;;  %v1021_v55 = vadd.s32 %v996_v17, %v973_v6  ;;  %v901_v18 = vadd.s32 %v2740_v20, %v853_v49  ;;  %v977_v35 = vmul.u32 16, %v961_v43 }
 0x1ba   : > { %v979_v20 = vmul.u32 16, %v963_v22 }
 0x1bb   : > { %1037 = vrot.lane.b32.xlu1 %v1018_v61, %s1259_s26  ;;  %1043 = vrot.lane.b32.xlu0 %v1021_v55, %s1259_s26  ;;  %v917_v26 = vmul.u32 8, %v901_v18 }
 0x1bc   : > { %v994_v27 = vpop.permute.xlu1 %993  ;;  %v1000_v39 = vpop.permute.xlu0 %999 }
 0x1bd   : > { %v1020_v10 = vadd.s32 %v994_v27, %v972_v7  ;;  %v1023_v54 = vadd.s32 %v1000_v39, %v975_v1  ;;  %v965_v61 = vadd.s32 %v2768_v2, %v917_v26 }
 0x1bf   : > { %1041 = vrot.lane.b32.xlu1 %v1020_v10, %s1259_s26  ;;  %1047 = vrot.lane.b32.xlu0 %v1023_v54, %s1259_s26  ;;  %v981_v7 = vmul.u32 16, %v965_v61 }
 0x1c0   : > { %v998_v28 = vpop.permute.xlu1 %997  ;;  %v1004_v15 = vpop.permute.xlu0 %1003 }
 0x1c1   : > { %v1022_v4 = vadd.s32 %v998_v28, %v974_v11  ;;  %v1025_v33 = vadd.s32 %v1004_v15, %v977_v35  ;;  %v3252_v11 = vld [vmem:[#allocation16_spill] sm:$0xff] }
 0x1c3   : > { %1045 = vrot.lane.b32.xlu1 %v1022_v4, %s1259_s26  ;;  %1051 = vrot.lane.b32.xlu0 %v1025_v33, %s1259_s26 }
 0x1c4   : > { %v1002_v29 = vpop.permute.xlu1 %1001  ;;  %v1008_v51 = vpop.permute.xlu0 %1007 }
 0x1c5   : > { %v1024_v63 = vadd.s32 %v1002_v29, %v976_v25  ;;  %v1027_v52 = vadd.s32 %v1008_v51, %v979_v20 }
 0x1c7   : > { %1049 = vrot.lane.b32.xlu1 %v1024_v63, %s1259_s26  ;;  %1055 = vrot.lane.b32.xlu0 %v1027_v52, %s1259_s26 }
 0x1c8   : > { %v1006_v36 = vpop.permute.xlu1 %1005  ;;  %v1012_v38 = vpop.permute.xlu0 %1011 }
 0x1c9   : > { %v1026_v32 = vadd.s32 %v1006_v36, %v978_v40  ;;  %v1029_v53 = vadd.s32 %v1012_v38, %v981_v7 }
 0x1cb   : > { %1053 = vrot.lane.b32.xlu1 %v1026_v32, %s1259_s26  ;;  %1059 = vrot.lane.b32.xlu0 %v1029_v53, %s1259_s26 }
 0x1cc   : > { %v1010_v9 = vpop.permute.xlu1 %1009 }
 0x1cd   : > { %v1028_v8 = vadd.s32 %v1010_v9, %v980_v44 }
 0x1cf   : > { %1057 = vrot.lane.b32.xlu1 %v1028_v8, %s1259_s26 }
 0x1d0   : > { %v1014_v62 = vpop.permute.xlu1 %1013 }
 0x1d1   : > { %v1030_v50 = vadd.s32 %v1014_v62, %v982_v23 }
 0x1d3   : > { %1061 = vrot.lane.b32.xlu1 %v1030_v50, %s1259_s26 }
 0x221   : > { %v1032_v41 = vpop.permute.xlu0 %1031 }
 0x222   : > { %v1063_v27 = vsel %vm3248_vm1, %v1032_v41, 4294967295 }
 0x223   : > { %1080 = vst.msk [vmem:[%s2816_s5] sm:$0xff] %vm1079_vm6, %v1063_v27 }
 0x225   : > { %v1036_v3 = vpop.permute.xlu0 %1035 }
 0x226   : > { %v1065_v10 = vsel %vm3250_vm15, %v1036_v3, 4294967295 }
 0x227   : > { %1082 = vst.msk [vmem:[%s2816_s5 + $0x10] sm:$0xff] %vm1079_vm6, %v1065_v10 }
 0x229   : > { %v1034_v2 = vpop.permute.xlu1 %1033  ;;  %v1040_v59 = vpop.permute.xlu0 %1039 }
 0x22a   : > { %v1064_v42 = vsel %vm3247_vm8, %v1034_v2, 4294967295  ;;  %vm3253_vm8 = vnez %v3252_v11 }
 0x22b   : > { %1081 = vst.msk [vmem:[%s2816_s5 + $0x8] sm:$0xff] %vm1079_vm6, %v1064_v42  ;;  %v1067_v6 = vsel %vm3253_vm8, %v1040_v59, 4294967295 }
 0x22c   : > { %1084 = vst.msk [vmem:[%s2816_s5 + $0x20] sm:$0xff] %vm1079_vm6, %v1067_v6 }
 0x22d   : > { %v1038_v60 = vpop.permute.xlu1 %1037  ;;  %v1044_v34 = vpop.permute.xlu0 %1043 }
 0x22e   : > { %v1066_v47 = vsel %vm3249_vm5, %v1038_v60, 4294967295  ;;  %v1069_v31 = vsel %vm2674_vm9, %v1044_v34, 4294967295 }
 0x22f   : > { %1083 = vst.msk [vmem:[%s2816_s5 + $0x18] sm:$0xff] %vm1079_vm6, %v1066_v47  ;;  %1086 = vst.msk [vmem:[%s2816_s5 + $0x30] sm:$0xff] %vm1079_vm6, %v1069_v31 }
 0x231   : > { %v1042_v46 = vpop.permute.xlu1 %1041  ;;  %v1048_v37 = vpop.permute.xlu0 %1047 }
 0x232   : > { %v1068_v48 = vsel %vm3251_vm11, %v1042_v46, 4294967295  ;;  %v1071_v13 = vsel %vm2686_vm10, %v1048_v37, 4294967295 }
 0x233   : > { %1085 = vst.msk [vmem:[%s2816_s5 + $0x28] sm:$0xff] %vm1079_vm6, %v1068_v48  ;;  %1088 = vst.msk [vmem:[%s2816_s5 + $0x40] sm:$0xff] %vm1079_vm6, %v1071_v13 }
 0x235   : > { %v1046_v14 = vpop.permute.xlu1 %1045  ;;  %v1052_v4 = vpop.permute.xlu0 %1051 }
 0x236   : > { %v1070_v57 = vsel %vm2668_vm14, %v1046_v14, 4294967295  ;;  %v1073_v5 = vsel %vm2698_vm3, %v1052_v4, 4294967295 }
 0x237   : > { %1087 = vst.msk [vmem:[%s2816_s5 + $0x38] sm:$0xff] %vm1079_vm6, %v1070_v57  ;;  %1090 = vst.msk [vmem:[%s2816_s5 + $0x50] sm:$0xff] %vm1079_vm6, %v1073_v5 }
 0x239   : > { %v1050_v16 = vpop.permute.xlu1 %1049  ;;  %v1056_v12 = vpop.permute.xlu0 %1055 }
 0x23a   : > { %v1072_v28 = vsel %vm2680_vm4, %v1050_v16, 4294967295  ;;  %v1075_v45 = vsel %vm2710_vm13, %v1056_v12, 4294967295 }
 0x23b   : > { %1089 = vst.msk [vmem:[%s2816_s5 + $0x48] sm:$0xff] %vm1079_vm6, %v1072_v28  ;;  %1092 = vst.msk [vmem:[%s2816_s5 + $0x60] sm:$0xff] %vm1079_vm6, %v1075_v45 }
 0x23d   : > { %v1054_v30 = vpop.permute.xlu1 %1053  ;;  %v1060_v63 = vpop.permute.xlu0 %1059 }
 0x23e   : > { %v1074_v25 = vsel %vm2692_vm2, %v1054_v30, 4294967295  ;;  %v1077_v56 = vsel %vm2722_vm7, %v1060_v63, 4294967295 }
 0x23f   : > { %1091 = vst.msk [vmem:[%s2816_s5 + $0x58] sm:$0xff] %vm1079_vm6, %v1074_v25  ;;  %1094 = vst.msk [vmem:[%s2816_s5 + $0x70] sm:$0xff] %vm1079_vm6, %v1077_v56 }
 0x241   : > { %v1058_v43 = vpop.permute.xlu1 %1057 }
 0x242   : > { %v1076_v29 = vsel %vm2704_vm12, %v1058_v43, 4294967295 }
 0x243   : > { %1093 = vst.msk [vmem:[%s2816_s5 + $0x68] sm:$0xff] %vm1079_vm6, %v1076_v29 }
 0x245   : > { %v1062_v18 = vpop.permute.xlu1 %1061 }
 0x246   : > { %v1078_v40 = vsel %vm2716_vm0, %v1062_v18, 4294967295 }
 0x247   : > { %1095 = vst.msk [vmem:[%s2816_s5 + $0x78] sm:$0xff] %vm1079_vm6, %v1078_v40 }
 0x248 PF: > { %s14_s12 = sadd.s32 1, %s1254_s12  }
 0x249   : > { %p11_p4 = scmp.ge.s32.totalorder %s14_s12, 4  }
 0x24b   :  { %13 = sbr.rel (!%p11_p4) target bundleno = 1 (0x1), region = 70 }

</bundles_post_ra>
